<compile_context>
chip_gen: v7x
topology: tpu7x:2x2x1
jax: 0.10.0
libtpu: 0.0.40
codegen_flags: <defaults>
</compile_context>

<pallas_src>
import jax
import jax.numpy as jnp
from jax.experimental import pallas as pl
from jax.experimental.pallas import tpu as pltpu

STATE_DIM = 2      # MountainCarContinuous-v0 observation dim
ACTION_DIM = 1     # MountainCarContinuous-v0 action dim
MAX_ACTION = 1.0   # env.action_space.high[0]
HIDDEN = 256
OUT_ROWS = 8       # sublane-padded output rows; action lives in row 0


def _round_up(x, m):
    return (x + m - 1) // m * m


def _bf16_elementwise_default():
    """bf16 VPU path exists on v6e / v7x; keep f32 elementwise on <= v5."""
    try:
        kind = jax.devices()[0].device_kind.lower()
    except Exception:
        return False
    return not any(tag in kind for tag in ("v2", "v3", "v4", "v5"))


def _choose_tiling(B, batch_tile):
    """Pick (padded_batch, batch_tile) with lane-aligned tiles and >=2 grid
    steps for mid/large batches (so v7x's second TensorCore gets work)."""
    bp = _round_up(max(B, 1), 8)
    if bp <= 128:
        return bp, bp                      # single block; full-dim lane width is legal
    bp = _round_up(bp, 128)
    tb = min(_round_up(batch_tile, 128), bp)
    if bp > 256 and tb >= bp:              # force >= 2 grid steps (megacore sharding)
        tb = max(128, _round_up(bp // 2, 128))
    bp = _round_up(bp, tb)
    return bp, tb


def _actor_kernel(xT_ref, w1T_ref, b1T_ref, w2T_ref, b2T_ref, w3T_ref, b3T_ref,
                  o_ref):
    xT = xT_ref[...]                        # [STATE_DIM, TB], f32 or bf16
    w1T = w1T_ref[...]                      # [HIDDEN, STATE_DIM], same dtype

    # ---- layer 1: VPU broadcast FMAs (K=2 would be a degenerate MXU matmul)
    h1 = b1T_ref[...]                       # [HIDDEN, 1] -> broadcasts over lanes
    for d in range(STATE_DIM):              # STATE_DIM is a compile-time constant
        h1 = h1 + w1T[:, d:d + 1] * xT[d:d + 1, :]     # [H,1]*[1,TB] -> [H,TB]
    h1 = jnp.maximum(h1, 0.0).astype(jnp.bfloat16)     # relu (+ MXU input dtype)

    # ---- layer 2: bf16 MXU matmul, f32 accumulate; bias + relu elementwise
    z2 = jnp.dot(w2T_ref[...], h1, preferred_element_type=jnp.float32)
    h2 = jnp.maximum(z2.astype(b2T_ref.dtype) + b2T_ref[...], 0.0)
    h2 = h2.astype(jnp.bfloat16)

    # ---- layer 3: bf16 MXU matmul into a lane-dense [OUT_ROWS, TB] slab
    z3 = jnp.dot(w3T_ref[...], h2, preferred_element_type=jnp.float32)
    out = jnp.tanh(z3 + b3T_ref[...])       # f32 tanh on the EUP (8 x TB only)
    if MAX_ACTION != 1.0:                   # compile-time constant; skip if 1.0
        out = MAX_ACTION * out
    o_ref[...] = out                        # full unmasked store


def actor_forward(state, params, *, batch_tile=1024, bf16_elementwise=None):
    """state: [B, STATE_DIM] f32 -> action: [B, ACTION_DIM] f32."""
    if bf16_elementwise is None:
        bf16_elementwise = _bf16_elementwise_default()
    ew = jnp.bfloat16 if bf16_elementwise else jnp.float32

    w1, b1, w2, b2, w3, b3 = params
    B = state.shape[0]
    bp, tb = _choose_tiling(B, batch_tile)

    # Lane-dense transposed input [STATE_DIM, bp] (batch on the lane axis).
    xT = state.astype(jnp.float32).T
    if bp != B:
        xT = jnp.pad(xT, ((0, 0), (0, bp - B)))
    xT = xT.astype(ew)

    # Transposed parameters: layer k computes h_k^T = W_k @ h_{k-1}^T + b_k^T.
    w1T = w1.T.astype(ew)                                   # [HIDDEN, STATE_DIM]
    b1T = b1.reshape(HIDDEN, 1).astype(ew)                  # [HIDDEN, 1]
    w2T = w2.T.astype(jnp.bfloat16)                         # [HIDDEN, HIDDEN]
    b2T = b2.reshape(HIDDEN, 1).astype(ew)                  # [HIDDEN, 1]
    w3T = jnp.zeros((OUT_ROWS, HIDDEN), jnp.bfloat16).at[:ACTION_DIM, :].set(
        w3.T.astype(jnp.bfloat16))                          # [8, HIDDEN], row 0 used
    b3T = jnp.zeros((OUT_ROWS, 1), jnp.float32).at[:ACTION_DIM, :].set(
        b3.reshape(ACTION_DIM, 1).astype(jnp.float32))      # [8, 1]

    grid = (bp // tb,)
    nbytes = lambda a: a.size * a.dtype.itemsize
    flops = 2 * bp * (STATE_DIM * HIDDEN + HIDDEN * HIDDEN + HIDDEN * OUT_ROWS)
    bytes_accessed = (nbytes(xT) + nbytes(w1T) + nbytes(b1T) + nbytes(w2T)
                      + nbytes(b2T) + nbytes(w3T) + nbytes(b3T)
                      + OUT_ROWS * bp * 4)

    out = pl.pallas_call(
        _actor_kernel,
        out_shape=jax.ShapeDtypeStruct((OUT_ROWS, bp), jnp.float32),
        grid=grid,
        in_specs=[
            pl.BlockSpec((STATE_DIM, tb), lambda i: (0, i)),       # xT tile
            pl.BlockSpec((HIDDEN, STATE_DIM), lambda i: (0, 0)),   # w1T (resident)
            pl.BlockSpec((HIDDEN, 1), lambda i: (0, 0)),           # b1T
            pl.BlockSpec((HIDDEN, HIDDEN), lambda i: (0, 0)),      # w2T (resident)
            pl.BlockSpec((HIDDEN, 1), lambda i: (0, 0)),           # b2T
            pl.BlockSpec((OUT_ROWS, HIDDEN), lambda i: (0, 0)),    # w3T padded rows
            pl.BlockSpec((OUT_ROWS, 1), lambda i: (0, 0)),         # b3T padded rows
        ],
        out_specs=pl.BlockSpec((OUT_ROWS, tb), lambda i: (0, i)),
        compiler_params=pltpu.CompilerParams(
            dimension_semantics=("parallel",)),
        cost_estimate=pl.CostEstimate(
            flops=flops,
            transcendentals=bp * OUT_ROWS,
            bytes_accessed=bytes_accessed),
    )(xT, w1T, b1T, w2T, b2T, w3T, b3T)

    return out[:ACTION_DIM, :B].T            # [B, ACTION_DIM]


def init_params(key):
    """Deterministic init mimicking PyTorch nn.Linear default (U[-1/sqrt(fan_in), +])."""
    def linear(key, fan_in, fan_out):
        kw, kb = jax.random.split(key)
        bound = 1.0 / jnp.sqrt(fan_in)
        # Stored as [in, out] (transposed relative to torch's [out, in]).
        w = jax.random.uniform(kw, (fan_in, fan_out), jnp.float32, -bound, bound)
        b = jax.random.uniform(kb, (1, fan_out), jnp.float32, -bound, bound)
        return w, b

    k1, k2, k3 = jax.random.split(key, 3)
    w1, b1 = linear(k1, STATE_DIM, HIDDEN)
    w2, b2 = linear(k2, HIDDEN, HIDDEN)
    w3, b3 = linear(k3, HIDDEN, ACTION_DIM)
    return (w1, b1, w2, b2, w3, b3)


def actor_forward_ref(state, params, bf16_elementwise=False):
    """Plain-JAX reference mirroring the kernel's numerics."""
    ew = jnp.bfloat16 if bf16_elementwise else jnp.float32
    w1, b1, w2, b2, w3, b3 = params
    x = state.astype(ew)
    w1e = w1.astype(ew)
    h1 = b1.reshape(1, HIDDEN).astype(ew)
    for d in range(STATE_DIM):
        h1 = h1 + x[:, d:d + 1] * w1e[d:d + 1, :]
    h1 = jnp.maximum(h1, 0.0).astype(jnp.bfloat16)
    z2 = jnp.dot(h1, w2.astype(jnp.bfloat16), preferred_element_type=jnp.float32)
    h2 = jnp.maximum(z2.astype(ew) + b2.reshape(1, HIDDEN).astype(ew), 0.0)
    h2 = h2.astype(jnp.bfloat16)
    z3 = jnp.dot(h2, w3.astype(jnp.bfloat16), preferred_element_type=jnp.float32)
    out = jnp.tanh(z3 + b3.reshape(1, ACTION_DIM).astype(jnp.float32))
    return MAX_ACTION * out if MAX_ACTION != 1.0 else out


def actor_forward_ref_f32(state, params):
    """Full-f32 reference matching the PyTorch module exactly."""
    w1, b1, w2, b2, w3, b3 = params
    h1 = jnp.maximum(state @ w1 + b1.reshape(1, -1), 0.0)
    h2 = jnp.maximum(h1 @ w2 + b2.reshape(1, -1), 0.0)
    return MAX_ACTION * jnp.tanh(h2 @ w3 + b3.reshape(1, -1))


if __name__ == "__main__":
    key = jax.random.PRNGKey(0)
    pkey, skey = jax.random.split(key)

    params = init_params(pkey)
    bf16_ew = _bf16_elementwise_default()

    # Small, deterministic acting-path batch.
    batch = 8
    state = jax.random.normal(skey, (batch, STATE_DIM), jnp.float32)

    out = jax.block_until_ready(actor_forward(state, params,
                                              bf16_elementwise=bf16_ew))
    assert out.shape == (batch, ACTION_DIM)

    ref = actor_forward_ref(state, params, bf16_elementwise=bf16_ew)
    assert jnp.allclose(out, ref, atol=1e-3, rtol=1e-3), \
        "mismatch vs numerics-matched reference"

    # Loose check against the exact f32 PyTorch-semantics reference
    # (difference is only bf16 weight/activation quantization).
    ref_f32 = actor_forward_ref_f32(state, params)
    assert jnp.allclose(out, ref_f32, atol=5e-2, rtol=5e-2), \
        "mismatch vs f32 reference"

    # Multi-tile rollout-sized batch exercising padding + >=2 grid steps.
    big_state = jax.random.normal(jax.random.PRNGKey(1), (300, STATE_DIM),
                                  jnp.float32)
    out_big = jax.block_until_ready(actor_forward(big_state, params,
                                                  bf16_elementwise=bf16_ew))
    ref_big = actor_forward_ref(big_state, params, bf16_elementwise=bf16_ew)
    assert out_big.shape == (300, ACTION_DIM)
    assert jnp.allclose(out_big, ref_big, atol=1e-3, rtol=1e-3), \
        "mismatch on multi-tile batch"

    print("KERNEL_OK")
</pallas_src>

<mosaic_0001>
module attributes {stable_mosaic.version = 11 : i64} {
  func.func @_actor_kernel(%arg0: i32, %arg1: memref<2x8xbf16, #tpu.memory_space<vmem>>, %arg2: memref<256x2xbf16, #tpu.memory_space<vmem>>, %arg3: memref<256x1xbf16, #tpu.memory_space<vmem>>, %arg4: memref<256x256xbf16, #tpu.memory_space<vmem>>, %arg5: memref<256x1xbf16, #tpu.memory_space<vmem>>, %arg6: memref<8x256xbf16, #tpu.memory_space<vmem>>, %arg7: memref<8x1xf32, #tpu.memory_space<vmem>>, %arg8: memref<8x8xf32, #tpu.memory_space<vmem>>) attributes {dimension_semantics = [#tpu.dimension_semantics<parallel>], iteration_bounds = array<i64: 1>, scalar_prefetch = 0 : i64, scratch_operands = 0 : i64, tpu.core_type = #tpu.core_type<tc>, window_params = [{transform_indices = @transform_0, window_bounds = array<i64: 2, 8>}, {pipeline_mode = #tpu.pipeline_mode<synchronous>, transform_indices = @transform_1, window_bounds = array<i64: 256, 2>}, {pipeline_mode = #tpu.pipeline_mode<synchronous>, transform_indices = @transform_2, window_bounds = array<i64: 256, 1>}, {pipeline_mode = #tpu.pipeline_mode<synchronous>, transform_indices = @transform_3, window_bounds = array<i64: 256, 256>}, {pipeline_mode = #tpu.pipeline_mode<synchronous>, transform_indices = @transform_4, window_bounds = array<i64: 256, 1>}, {pipeline_mode = #tpu.pipeline_mode<synchronous>, transform_indices = @transform_5, window_bounds = array<i64: 8, 256>}, {pipeline_mode = #tpu.pipeline_mode<synchronous>, transform_indices = @transform_6, window_bounds = array<i64: 8, 1>}, {transform_indices = @transform_7, window_bounds = array<i64: 8, 8>}]} {
    %c0 = arith.constant 0 : index
    %c0_0 = arith.constant 0 : index
    %0 = vector.load %arg1[%c0, %c0_0] : memref<2x8xbf16, #tpu.memory_space<vmem>>, vector<2x8xbf16>
    %c0_1 = arith.constant 0 : index
    %c0_2 = arith.constant 0 : index
    %1 = vector.load %arg2[%c0_1, %c0_2] : memref<256x2xbf16, #tpu.memory_space<vmem>>, vector<256x2xbf16>
    %c0_3 = arith.constant 0 : index
    %c0_4 = arith.constant 0 : index
    %2 = vector.load %arg3[%c0_3, %c0_4] : memref<256x1xbf16, #tpu.memory_space<vmem>>, vector<256x1xbf16>
    %3 = vector.extract_strided_slice %1 {offsets = [0, 0], sizes = [256, 1], strides = [1, 1]} : vector<256x2xbf16> to vector<256x1xbf16>
    %4 = vector.extract_strided_slice %0 {offsets = [0, 0], sizes = [1, 8], strides = [1, 1]} : vector<2x8xbf16> to vector<1x8xbf16>
    %5 = vector.broadcast %3 : vector<256x1xbf16> to vector<256x8xbf16>
    %6 = vector.broadcast %4 : vector<1x8xbf16> to vector<256x8xbf16>
    %7 = arith.mulf %5, %6 : vector<256x8xbf16>
    %8 = vector.broadcast %2 : vector<256x1xbf16> to vector<256x8xbf16>
    %9 = arith.addf %8, %7 : vector<256x8xbf16>
    %10 = vector.extract_strided_slice %1 {offsets = [0, 1], sizes = [256, 1], strides = [1, 1]} : vector<256x2xbf16> to vector<256x1xbf16>
    %11 = vector.extract_strided_slice %0 {offsets = [1, 0], sizes = [1, 8], strides = [1, 1]} : vector<2x8xbf16> to vector<1x8xbf16>
    %12 = vector.broadcast %10 : vector<256x1xbf16> to vector<256x8xbf16>
    %13 = vector.broadcast %11 : vector<1x8xbf16> to vector<256x8xbf16>
    %14 = arith.mulf %12, %13 : vector<256x8xbf16>
    %15 = arith.addf %9, %14 : vector<256x8xbf16>
    %cst = arith.constant 0.000000e+00 : bf16
    %16 = vector.broadcast %cst : bf16 to vector<256x8xbf16>
    %17 = arith.maximumf %15, %16 : vector<256x8xbf16>
    %c0_5 = arith.constant 0 : index
    %c0_6 = arith.constant 0 : index
    %18 = vector.load %arg4[%c0_5, %c0_6] : memref<256x256xbf16, #tpu.memory_space<vmem>>, vector<256x256xbf16>
    %cst_7 = arith.constant dense<0.000000e+00> : vector<256x8xf32>
    %19 = tpu.matmul %18, %17, %cst_7 {dimension_numbers = #tpu.dot_dimension_numbers<[1], [0], [0], [1], [0, 0, 1, 1], [], []>} : vector<256x256xbf16>, vector<256x8xbf16>, vector<256x8xf32> -> vector<256x8xf32>
    %20 = arith.truncf %19 : vector<256x8xf32> to vector<256x8xbf16>
    %c0_8 = arith.constant 0 : index
    %c0_9 = arith.constant 0 : index
    %21 = vector.load %arg5[%c0_8, %c0_9] : memref<256x1xbf16, #tpu.memory_space<vmem>>, vector<256x1xbf16>
    %22 = vector.broadcast %21 : vector<256x1xbf16> to vector<256x8xbf16>
    %23 = arith.addf %20, %22 : vector<256x8xbf16>
    %cst_10 = arith.constant 0.000000e+00 : bf16
    %24 = vector.broadcast %cst_10 : bf16 to vector<256x8xbf16>
    %25 = arith.maximumf %23, %24 : vector<256x8xbf16>
    %c0_11 = arith.constant 0 : index
    %c0_12 = arith.constant 0 : index
    %26 = vector.load %arg6[%c0_11, %c0_12] : memref<8x256xbf16, #tpu.memory_space<vmem>>, vector<8x256xbf16>
    %cst_13 = arith.constant dense<0.000000e+00> : vector<8x8xf32>
    %27 = tpu.matmul %26, %25, %cst_13 {dimension_numbers = #tpu.dot_dimension_numbers<[1], [0], [0], [1], [0, 0, 1, 1], [], []>} : vector<8x256xbf16>, vector<256x8xbf16>, vector<8x8xf32> -> vector<8x8xf32>
    %c0_14 = arith.constant 0 : index
    %c0_15 = arith.constant 0 : index
    %28 = vector.load %arg7[%c0_14, %c0_15] : memref<8x1xf32, #tpu.memory_space<vmem>>, vector<8x1xf32>
    %29 = vector.broadcast %28 : vector<8x1xf32> to vector<8x8xf32>
    %30 = arith.addf %27, %29 : vector<8x8xf32>
    %31 = math.tanh %30 : vector<8x8xf32>
    %c0_16 = arith.constant 0 : index
    %c0_17 = arith.constant 0 : index
    %32 = vector.load %arg8[%c0_16, %c0_17] : memref<8x8xf32, #tpu.memory_space<vmem>>, vector<8x8xf32>
    tpu.vector_store %arg8[%c0_16, %c0_17], %31 {strides = array<i32>} : memref<8x8xf32, #tpu.memory_space<vmem>>, vector<8x8xf32>,
    return
  }
  func.func @transform_0(%arg0: i32) -> (i32, i32) {
    %c0_i32 = arith.constant 0 : i32
    %c0_i32_0 = arith.constant 0 : i32
    return %c0_i32, %arg0 : i32, i32
  }
  func.func @transform_1(%arg0: i32) -> (i32, i32) {
    %c0_i32 = arith.constant 0 : i32
    %c0_i32_0 = arith.constant 0 : i32
    %c0_i32_1 = arith.constant 0 : i32
    return %c0_i32, %c0_i32_0 : i32, i32
  }
  func.func @transform_2(%arg0: i32) -> (i32, i32) {
    %c0_i32 = arith.constant 0 : i32
    %c0_i32_0 = arith.constant 0 : i32
    %c0_i32_1 = arith.constant 0 : i32
    return %c0_i32, %c0_i32_0 : i32, i32
  }
  func.func @transform_3(%arg0: i32) -> (i32, i32) {
    %c0_i32 = arith.constant 0 : i32
    %c0_i32_0 = arith.constant 0 : i32
    %c0_i32_1 = arith.constant 0 : i32
    return %c0_i32, %c0_i32_0 : i32, i32
  }
  func.func @transform_4(%arg0: i32) -> (i32, i32) {
    %c0_i32 = arith.constant 0 : i32
    %c0_i32_0 = arith.constant 0 : i32
    %c0_i32_1 = arith.constant 0 : i32
    return %c0_i32, %c0_i32_0 : i32, i32
  }
  func.func @transform_5(%arg0: i32) -> (i32, i32) {
    %c0_i32 = arith.constant 0 : i32
    %c0_i32_0 = arith.constant 0 : i32
    %c0_i32_1 = arith.constant 0 : i32
    return %c0_i32, %c0_i32_0 : i32, i32
  }
  func.func @transform_6(%arg0: i32) -> (i32, i32) {
    %c0_i32 = arith.constant 0 : i32
    %c0_i32_0 = arith.constant 0 : i32
    %c0_i32_1 = arith.constant 0 : i32
    return %c0_i32, %c0_i32_0 : i32, i32
  }
  func.func @transform_7(%arg0: i32) -> (i32, i32) {
    %c0_i32 = arith.constant 0 : i32
    %c0_i32_0 = arith.constant 0 : i32
    return %c0_i32, %arg0 : i32, i32
  }
}

</mosaic_0001>

<bundles_post_ra>
// kernel: tpu_custom_call.1
= control target key start
LH: loop header
LB: loop body
LE: loop exit
PB: predicated region body
PF: predicated region fallthrough
CT: control target
= control target key end

     0   :  { %v2808_v2 = vmov 1   ;;  %v3853_v3 = vmov 0   ;;  %s3845_s0 = inlined_call_operand.vmem [shape: bf16[2,8], index: 0, kind: input, shape index: {}]   ;;  %s3846_s1 = inlined_call_operand.vmem [shape: bf16[256,2], index: 1, kind: input, shape index: {}]   ;;  %s3847_s2 = inlined_call_operand.vmem [shape: bf16[256,1], index: 2, kind: input, shape index: {}]   ;;  %s3848_s3 = inlined_call_operand.vmem [shape: bf16[256,256], index: 3, kind: input, shape index: {}]   ;;  %s3849_s4 = inlined_call_operand.vmem [shape: bf16[256,1], index: 4, kind: input, shape index: {}]   ;;  %s3850_s5 = inlined_call_operand.vmem [shape: bf16[8,256], index: 5, kind: input, shape index: {}]   ;;  %s3851_s6 = inlined_call_operand.vmem [shape: f32[8,1], index: 6, kind: input, shape index: {}]   ;;  %s3852_s7 = inlined_call_operand.hbm [shape: f32[8,8], index: 7, kind: output, shape index: {}]  }
   0x1   :  { %v45_v0 = vld [vmem:[%s3846_s1 + $0x40] sm:$0xf]  ;;  %2698 = vset.pattern.permute.xlu0 %v2808_v2  ;;  %2697 = vset.pattern.permute.xlu1 %v3853_v3  ;;  %v47_v4 = vld [vmem:[%s3846_s1 + $0x48] sm:$0xf]  ;;  %v30_v5 = vld [vmem:[%s3846_s1 + $0x4] sm:$0xf] }
   0x2   :  { %v29_v1 = vld [vmem:[%s3846_s1] sm:$0xf]  ;;  %1113 = vperm.xlu0 %2698, %v45_v0   ;;  %v49_v6 = vld [vmem:[%s3846_s1 + $0x50] sm:$0xf]  ;;  %v78_v7 = vld [vmem:[%s3847_s2 + $0x44] sm:$0xf] }
   0x3   :  { %95 = vperm.xlu1 %2697, %v29_v1   ;;  %v2875_v8 = vld [vmem:[%s3846_s1 + $0x58] sm:$0xf]  ;;  %v46_v9 = vld [vmem:[%s3846_s1 + $0x44] sm:$0xf]  ;;  %v2885_v10 = vld [vmem:[%s3846_s1 + $0x60] sm:$0xf] }
   0x4   :  { %v61_v11 = vld [vmem:[%s3847_s2] sm:$0xf]  ;;  %v2895_v12 = vld [vmem:[%s3846_s1 + $0x68] sm:$0xf]  ;;  %v2901_v13 = vld [vmem:[%s3846_s1 + $0x70] sm:$0xf] }
   0x5   :  { %v2908_v14 = vld [vmem:[%s3846_s1 + $0x78] sm:$0xf] }
   0x6   :  { %1135 = vperm.xlu0 %2698, %v47_v4  }
   0x7   :  { %107 = vperm.xlu1 %2697, %v30_v5  }
   0xa   :  { %1157 = vperm.xlu0 %2698, %v49_v6  }
   0xb   :  { %726 = vperm.xlu1 %2697, %v78_v7  }
   0xe   :  { %1179 = vperm.xlu0 %2698, %v2875_v8  }
   0xf   :  { %2699 = vset.pattern.permute.xlu1 %v2808_v2 }
  0x10   :  { %1124 = vperm.xlu1 %2699, %v46_v9  }
  0x12   :  { %1201 = vperm.xlu0 %2698, %v2885_v10  }
  0x14   :  { %2700 = vset.pattern.permute.xlu1 %v3853_v3 }
  0x15   :  { %522 = vperm.xlu1 %2700, %v61_v11  }
  0x16   :  { %1223 = vperm.xlu0 %2698, %v2895_v12  }
  0x19   :  { %2701 = vset.pattern.permute.xlu1 %v2808_v2 }
  0x1a   :  { %937 = vperm.xlu1 %2701, %v29_v1   ;;  %1245 = vperm.xlu0 %2698, %v2901_v13  }
  0x1e   :  { %948 = vperm.xlu1 %2701, %v30_v5  }
  0x1f   :  { %12 = vsyncpa [#allocation3], 0  ;;  %1267 = vperm.xlu0 %2698, %v2908_v14   ;;  %v48_v15 = vld [vmem:[%s3846_s1 + $0x4c] sm:$0xf]  ;;  %v77_v18 = vld [vmem:[%s3847_s2 + $0x40] sm:$0xf]  ;;  %v101_v63 = vlaneseq }
  0x20   :  { %v32_v16 = vld [vmem:[%s3846_s1 + $0xc] sm:$0xf]  ;;  %v62_v19 = vld [vmem:[%s3847_s2 + $0x4] sm:$0xf]  ;;  %v63_v20 = vld [vmem:[%s3847_s2 + $0x8] sm:$0xf] }
  0x21   :  { %v80_v17 = vld [vmem:[%s3847_s2 + $0x4c] sm:$0xf]  ;;  %v31_v21 = vld [vmem:[%s3846_s1 + $0x8] sm:$0xf]  ;;  %v50_v24 = vld [vmem:[%s3846_s1 + $0x54] sm:$0xf] }
  0x22   :  { %2702 = vset.pattern.permute.xlu1 %v3853_v3  ;;  %v79_v22 = vld [vmem:[%s3847_s2 + $0x48] sm:$0xf]  ;;  %v64_v23 = vld [vmem:[%s3847_s2 + $0xc] sm:$0xf]  ;;  %v34_v25 = vld [vmem:[%s3846_s1 + $0x14] sm:$0xf] }
  0x23   :  { %2727 = vset.pattern.permute.xlu0 %v3853_v3  ;;  %323 = vperm.xlu1 %2702, %v48_v15   ;;  %v33_v26 = vld [vmem:[%s3846_s1 + $0x10] sm:$0xf]  ;;  %v82_v27 = vld [vmem:[%s3847_s2 + $0x54] sm:$0xf]  ;;  %v35_v31 = vld [vmem:[%s3846_s1 + $0x18] sm:$0xf] }
  0x24   :  { %287 = vperm.xlu0 %2727, %v45_v0   ;;  %v81_v28 = vld [vmem:[%s3847_s2 + $0x50] sm:$0xf]  ;;  %v66_v29 = vld [vmem:[%s3847_s2 + $0x14] sm:$0xf]  ;;  %v83_v32 = vld [vmem:[%s3847_s2 + $0x58] sm:$0xf] }
  0x25   :  { %v65_v30 = vld [vmem:[%s3847_s2 + $0x10] sm:$0xf]  ;;  %v68_v33 = vld [vmem:[%s3847_s2 + $0x1c] sm:$0xf]  ;;  %v37_v36 = vld [vmem:[%s3846_s1 + $0x20] sm:$0xf] }
  0x26   :  { %v52_v34 = vld [vmem:[%s3846_s1 + $0x5c] sm:$0xf]  ;;  %v85_v38 = vld [vmem:[%s3847_s2 + $0x60] sm:$0xf]  ;;  %v70_v39 = vld [vmem:[%s3847_s2 + $0x24] sm:$0xf] }
  0x27   :  { %131 = vperm.xlu1 %2702, %v32_v16   ;;  %v36_v35 = vld [vmem:[%s3846_s1 + $0x1c] sm:$0xf]  ;;  %v67_v40 = vld [vmem:[%s3847_s2 + $0x18] sm:$0xf]  ;;  %v3007_v41 = vld [vmem:[%s3846_s1 + $0x28] sm:$0xf] }
  0x28   :  { %299 = vperm.xlu0 %2727, %v46_v9   ;;  %v84_v37 = vld [vmem:[%s3847_s2 + $0x5c] sm:$0xf]  ;;  %v87_v42 = vld [vmem:[%s3847_s2 + $0x68] sm:$0xf]  ;;  %v72_v43 = vld [vmem:[%s3847_s2 + $0x2c] sm:$0xf] }
  0x29   :  { %v54_v44 = vld [vmem:[%s3846_s1 + $0x64] sm:$0xf]  ;;  %v3032_v48 = vld [vmem:[%s3846_s1 + $0x30] sm:$0xf]  ;;  %v74_v55 = vld [vmem:[%s3847_s2 + $0x34] sm:$0xf] }
  0x2a   :  { %v38_v47 = vld [vmem:[%s3846_s1 + $0x24] sm:$0xf]  ;;  %v89_v52 = vld [vmem:[%s3847_s2 + $0x70] sm:$0xf]  ;;  %v69_v59 = vld [vmem:[%s3847_s2 + $0x20] sm:$0xf] }
  0x2b   :  { %750 = vperm.xlu1 %2702, %v80_v17   ;;  %v86_v51 = vld [vmem:[%s3847_s2 + $0x64] sm:$0xf]  ;;  %v3069_v61 = vld [vmem:[%s3846_s1 + $0x38] sm:$0xf]  ;;  %v2810_v5 = vmov 839922192  }
  0x2c   :  { %714 = vperm.xlu0 %2727, %v77_v18   ;;  %v91_v1 = vld [vmem:[%s3847_s2 + $0x78] sm:$0xf]  ;;  %v102_v7 = vshrl.u32 %v101_v63, 7  ;;  %v76_v11 = vld [vmem:[%s3847_s2 + $0x3c] sm:$0xf]  ;;  %vm2459_vm0 = vcmask 64512  }
  0x2d   :  { %v1876_v18 = vld [vmem:[%s3849_s4 + $0x40] sm:$0xf] }
  0x2f   :  { %2703 = vset.pattern.permute.xlu1 %v2808_v2 }
  0x30   :  { %534 = vperm.xlu0 %2727, %v62_v19   ;;  %1146 = vperm.xlu1 %2703, %v48_v15  }
  0x34   :  { %311 = vperm.xlu0 %2727, %v47_v4   ;;  %2704 = vset.pattern.permute.xlu1 %v3853_v3 }
  0x35   :  { %546 = vperm.xlu1 %2704, %v63_v20  }
  0x38   :  { %119 = vperm.xlu0 %2727, %v31_v21  }
  0x39   :  { %2705 = vset.pattern.permute.xlu1 %v2808_v2 }
  0x3a   :  { %959 = vperm.xlu1 %2705, %v31_v21  }
  0x3c   :  { %738 = vperm.xlu0 %2727, %v79_v22  }
  0x3e   :  { %970 = vperm.xlu1 %2705, %v32_v16   ;;  %v56_v16 = vld [vmem:[%s3846_s1 + $0x6c] sm:$0xf] }
  0x40   :  { %558 = vperm.xlu0 %2727, %v64_v23   ;;  %v3104_v23 = vld [vmem:[%s3846_s1 + $0x2c] sm:$0xf] }
  0x42   :  { %2706 = vset.pattern.permute.xlu1 %v3853_v3 }
  0x43   :  { %347 = vperm.xlu1 %2706, %v50_v24  }
  0x44   :  { %335 = vperm.xlu0 %2727, %v49_v6   ;;  %v99_v6 = vunpack.c.l.s4 %v2810_v5 }
  0x47   :  { %155 = vperm.xlu1 %2706, %v34_v25  }
  0x48   :  { %143 = vperm.xlu0 %2727, %v33_v26  }
  0x4b   :  { %774 = vperm.xlu1 %2706, %v82_v27  }
  0x4c   :  { %762 = vperm.xlu0 %2727, %v81_v28  }
  0x4f   :  { %2707 = vset.pattern.permute.xlu1 %v2808_v2 }
  0x50   :  { %582 = vperm.xlu0 %2727, %v66_v29   ;;  %1168 = vperm.xlu1 %2707, %v50_v24  }
  0x54   :  { %359 = vperm.xlu0 %2727, %v2875_v8   ;;  %2708 = vset.pattern.permute.xlu1 %v3853_v3  ;;  %v28_v8 = vld [vmem:[%s3845_s0] sm:$0x1] }
  0x55   :  { %570 = vperm.xlu1 %2708, %v65_v30   ;;  %v1288_v9 = vshrl.u32 %v28_v8, 16  ;;  %v478_v15 = vpack.i.b16 %v28_v8, %v28_v8  ;;  %v1880_v8 = vld [vmem:[%s3849_s4 + $0x50] sm:$0xf] }
  0x57   :  { %v1289_v17 = vpack.i.b16 %v1288_v9, %v1288_v9 }
  0x58   :  { %167 = vperm.xlu0 %2727, %v35_v31  }
  0x59   :  { %2709 = vset.pattern.permute.xlu1 %v2808_v2 }
  0x5a   :  { %981 = vperm.xlu1 %2709, %v33_v26  }
  0x5c   :  { %786 = vperm.xlu0 %2727, %v83_v32   ;;  %v88_v32 = vld [vmem:[%s3847_s2 + $0x6c] sm:$0xf] }
  0x5e   :  { %992 = vperm.xlu1 %2709, %v34_v25   ;;  %v1860_v25 = vld [vmem:[%s3849_s4] sm:$0xf] }
  0x60   :  { %606 = vperm.xlu0 %2727, %v68_v33  }
  0x62   :  { %2710 = vset.pattern.permute.xlu1 %v3853_v3 }
  0x63   :  { %371 = vperm.xlu1 %2710, %v52_v34  }
  0x64   :  { %383 = vperm.xlu0 %2727, %v2885_v10  }
  0x67   :  { %179 = vperm.xlu1 %2710, %v36_v35  }
  0x68   :  { %191 = vperm.xlu0 %2727, %v37_v36  }
  0x6b   :  { %798 = vperm.xlu1 %2710, %v84_v37  }
  0x6c   :  { %810 = vperm.xlu0 %2727, %v85_v38  }
  0x6f   :  { %2711 = vset.pattern.permute.xlu1 %v2808_v2 }
  0x70   :  { %630 = vperm.xlu0 %2727, %v70_v39   ;;  %1190 = vperm.xlu1 %2711, %v52_v34  }
  0x74   :  { %407 = vperm.xlu0 %2727, %v2895_v12   ;;  %2712 = vset.pattern.permute.xlu1 %v3853_v3 }
  0x75   :  { %594 = vperm.xlu1 %2712, %v67_v40  }
  0x78   :  { %215 = vperm.xlu0 %2727, %v3007_v41  }
  0x79   :  { %2713 = vset.pattern.permute.xlu1 %v2808_v2 }
  0x7a   :  { %1003 = vperm.xlu1 %2713, %v35_v31  }
  0x7c   :  { %834 = vperm.xlu0 %2727, %v87_v42  }
  0x7e   :  { %1014 = vperm.xlu1 %2713, %v36_v35  }
  0x80   :  { %654 = vperm.xlu0 %2727, %v72_v43  }
  0x81   :  { %v3023_v46 = vpop.permute.xlu0 %1113 }
  0x82   :  { %2714 = vset.pattern.permute.xlu1 %v3853_v3  ;;  %v3021_v45 = vpop.permute.xlu1 %95 }
  0x83   :  { %395 = vperm.xlu1 %2714, %v54_v44  }
  0x84   :  { %431 = vperm.xlu0 %2727, %v2901_v13   ;;  %v100_v13 = vunpack.c.0.s8 %v99_v6 }
  0x85   :  { %v3036_v50 = vpop.permute.xlu0 %1135 }
  0x86   :  { %v3034_v49 = vpop.permute.xlu1 %107  ;;  %v3099_v21 = vsub.s32 %v100_v13, %v102_v7 }
  0x87   :  { %203 = vperm.xlu1 %2714, %v38_v47  }
  0x88   :  { %239 = vperm.xlu0 %2727, %v3032_v48   ;;  %v1122_v30 = vrot.slane %v3023_v46, %v3099_v21  ;;  %v104_v33 = vrot.slane %v3021_v45, %v3099_v21  ;;  %v116_v43 = vrot.slane %v3034_v49, %v3099_v21 }
  0x89   :  { %v3047_v54 = vpop.permute.xlu0 %1157 }
  0x8a   :  { %v3045_v53 = vpop.permute.xlu1 %726 }
  0x8b   :  { %822 = vperm.xlu1 %2714, %v86_v51   ;;  %v735_v37 = vrot.slane %v3045_v53, %v3099_v21  ;;  %v1862_v53 = vld [vmem:[%s3849_s4 + $0x8] sm:$0xf] }
  0x8c   :  { %858 = vperm.xlu0 %2727, %v89_v52  }
  0x8d   :  { %v3052_v56 = vpop.permute.xlu0 %1179 }
  0x8f   :  { %2715 = vset.pattern.permute.xlu1 %v2808_v2  ;;  %v3055_v57 = vpop.permute.xlu1 %1124 }
  0x90   :  { %678 = vperm.xlu0 %2727, %v74_v55   ;;  %1212 = vperm.xlu1 %2715, %v54_v44   ;;  %v1133_v35 = vrot.slane %v3055_v57, %v3099_v21 }
  0x91   :  { %v3057_v58 = vpop.permute.xlu0 %1201 }
  0x94   :  { %455 = vperm.xlu0 %2727, %v2908_v14   ;;  %2716 = vset.pattern.permute.xlu1 %v3853_v3  ;;  %v3064_v60 = vpop.permute.xlu1 %522  ;;  %v482_v14 = vsub.s32 0, %v102_v7 }
  0x95   :  { %618 = vperm.xlu1 %2716, %v69_v59   ;;  %v3071_v62 = vpop.permute.xlu0 %1223  ;;  %v531_v46 = vrot.slane %v3064_v60, %v3099_v21 }
  0x96   :  { %v483_v22 = vrot.slane %v478_v15, %v482_v14  ;;  %v1294_v24 = vrot.slane %v1289_v17, %v482_v14 }
  0x98   :  { %263 = vperm.xlu0 %2727, %v3069_v61   ;;  %v3113_v29 = vcombine.low %v483_v22, %v483_v22  ;;  %v3123_v34 = vcombine.low %v1294_v24, %v1294_v24 }
  0x99   :  { %2717 = vset.pattern.permute.xlu1 %v2808_v2  ;;  %v938_v0 = vpop.permute.xlu1 %937  ;;  %v3078_v4 = vpop.permute.xlu0 %1245 }
  0x9a   :  { %1025 = vperm.xlu1 %2717, %v37_v36   ;;  %v1878_v36 = vld [vmem:[%s3849_s4 + $0x48] sm:$0xf]  ;;  %v946_v38 = vrot.slane %v938_v0, %v3099_v21  ;;  %v1315_v45 = vmul.bf16 %v3123_v34, %v1122_v30  ;;  %v1316_v52 = vmul.bf16 %v3123_v34, %v1133_v35  ;;  %v488_v55 = vmul.bf16 %v3113_v29, %v104_v33 }
  0x9b   :  { %v489_v60 = vmul.bf16 %v3113_v29, %v116_v43 }
  0x9c   :  { %882 = vperm.xlu0 %2727, %v91_v1   ;;  %v1299_v49 = vmul.bf16 %v3123_v34, %v946_v38  ;;  %v904_v5 = vadd.bf16 %v531_v46, %v488_v55 }
  0x9d   :  { %v3083_v10 = vpop.permute.xlu1 %948 }
  0x9e   :  { %1036 = vperm.xlu1 %2717, %v38_v47   ;;  %v3088_v12 = vpop.permute.xlu0 %1267  ;;  %v957_v57 = vrot.slane %v3083_v10, %v3099_v21  ;;  %v1331_v14 = vadd.bf16 %v1299_v49, %v904_v5  ;;  %v1884_v5 = vld [vmem:[%s3849_s4 + $0x60] sm:$0xf] }
  0xa0   :  { %702 = vperm.xlu0 %2727, %v76_v11   ;;  %v1300_v9 = vmul.bf16 %v3123_v34, %v957_v57  ;;  %v71_v11 = vld [vmem:[%s3847_s2 + $0x28] sm:$0xf] }
  0xa2   :  { %2718 = vset.pattern.permute.xlu1 %v3853_v3  ;;  %v3097_v19 = vpop.permute.xlu1 %323 }
  0xa3   :  { %v288_v20 = vpop.permute.xlu0 %287  ;;  %419 = vperm.xlu1 %2718, %v56_v16  }
  0xa4   :  { %2086 = vperm.xlu0 %2727, %v1876_v18   ;;  %v296_v26 = vrot.slane %v288_v20, %v3099_v21  ;;  %v332_v20 = vrot.slane %v3097_v19, %v3099_v21 }
  0xa6   :  { %v3110_v27 = vpop.permute.xlu1 %131  ;;  %v504_v39 = vmul.bf16 %v3113_v29, %v296_v26 }
  0xa7   :  { %v300_v28 = vpop.permute.xlu0 %299  ;;  %227 = vperm.xlu1 %2718, %v3104_v23   ;;  %v140_v46 = vrot.slane %v3110_v27, %v3099_v21 }
  0xa8   :  { %v308_v31 = vrot.slane %v300_v28, %v3099_v21  ;;  %1894 = vperm.xlu0 %2727, %v1860_v25   ;;  %v1864_v25 = vld [vmem:[%s3849_s4 + $0x10] sm:$0xf]  ;;  %v1363_v28 = vmax.bf16 %v3853_v3, %v1331_v14 }
  0xaa   :  { %v505_v40 = vmul.bf16 %v3113_v29, %v308_v31  ;;  %v3135_v42 = vpop.permute.xlu1 %750 }
  0xab   :  { %v715_v44 = vpop.permute.xlu0 %714  ;;  %846 = vperm.xlu1 %2718, %v88_v32   ;;  %v759_v31 = vrot.slane %v3135_v42, %v3099_v21  ;;  %v1144_v32 = vrot.slane %v3036_v50, %v3099_v21 }
  0xac   :  { %v921_v47 = vadd.bf16 %v735_v37, %v505_v40  ;;  %v723_v51 = vrot.slane %v715_v44, %v3099_v21  ;;  %2110 = vperm.xlu0 %2727, %v1878_v36   ;;  %v507_v36 = vmul.bf16 %v3113_v29, %v332_v20 }
  0xae   :  { %v920_v59 = vadd.bf16 %v723_v51, %v504_v39  ;;  %v1348_v1 = vadd.bf16 %v1316_v52, %v921_v47  ;;  %v1882_v39 = vld [vmem:[%s3849_s4 + $0x58] sm:$0xf]  ;;  %v923_v43 = vadd.bf16 %v759_v31, %v507_v36  ;;  %v1870_v36 = vld [vmem:[%s3849_s4 + $0x28] sm:$0xf] }
  0xaf   :  { %v535_v63 = vpop.permute.xlu0 %534  ;;  %2719 = vset.pattern.permute.xlu1 %v2808_v2  ;;  %v1147_v0 = vpop.permute.xlu1 %1146 }
  0xb0   :  { %v1347_v6 = vadd.bf16 %v1315_v45, %v920_v59  ;;  %v543_v7 = vrot.slane %v535_v63, %v3099_v21  ;;  %1918 = vperm.xlu0 %2727, %v1862_v53   ;;  %1234 = vperm.xlu1 %2719, %v56_v16   ;;  %v1380_v17 = vmax.bf16 %v3853_v3, %v1348_v1  ;;  %v58_v1 = vld [vmem:[%s3846_s1 + $0x74] sm:$0xf] }
  0xb1   :  { %v1155_v22 = vrot.slane %v1147_v0, %v3099_v21  ;;  %v1317_v45 = vmul.bf16 %v3123_v34, %v1144_v32 }
  0xb2   :  { %v905_v10 = vadd.bf16 %v543_v7, %v489_v60  ;;  %v1379_v13 = vmax.bf16 %v3853_v3, %v1347_v6  ;;  %v491_v60 = vmul.bf16 %v3113_v29, %v140_v46  ;;  %v73_v46 = vld [vmem:[%s3847_s2 + $0x30] sm:$0xf] }
  0xb3   :  { %v312_v15 = vpop.permute.xlu0 %311  ;;  %v1318_v37 = vmul.bf16 %v3123_v34, %v1155_v22 }
  0xb4   :  { %v1332_v18 = vadd.bf16 %v1300_v9, %v905_v10  ;;  %2134 = vperm.xlu0 %2727, %v1880_v8   ;;  %2720 = vset.pattern.permute.xlu1 %v3853_v3  ;;  %v547_v16 = vpop.permute.xlu1 %546  ;;  %v2517_v24 = vcombine.low %v1379_v13, %v1380_v17  ;;  %v320_v26 = vrot.slane %v312_v15, %v3099_v21  ;;  %v3214_v15 = vld [vmem:[%s3846_s1 + $0x34] sm:$0xf]  ;;  %v1868_v17 = vld [vmem:[%s3849_s4 + $0x20] sm:$0xf] }
  0xb5   :  { %642 = vperm.xlu1 %2720, %v71_v11   ;;  %v555_v47 = vrot.slane %v547_v16, %v3099_v21  ;;  %v1350_v52 = vadd.bf16 %v1318_v37, %v923_v43  ;;  %v1888_v43 = vld [vmem:[%s3849_s4 + $0x70] sm:$0xf] }
  0xb6   :  { %v1364_v30 = vmax.bf16 %v3853_v3, %v1332_v18  ;;  %2543 = vmatprep.subr.bf16.mxu0 %v2517_v24  ;;  %2677 = vmatprep.subr.bf16.mxu1 %v2517_v24  ;;  %v506_v40 = vmul.bf16 %v3113_v29, %v320_v26 }
  0xb7   :  { %v120_v19 = vpop.permute.xlu0 %119  ;;  %v1382_v6 = vmax.bf16 %v3853_v3, %v1350_v52 }
  0xb8   :  { %v128_v33 = vrot.slane %v120_v19, %v3099_v21  ;;  %1942 = vperm.xlu0 %2727, %v1864_v25   ;;  %v2509_v35 = vcombine.low %v1363_v28, %v1364_v30  ;;  %v1166_v25 = vrot.slane %v3047_v54, %v3099_v21  ;;  %v90_v28 = vld [vmem:[%s3847_s2 + $0x74] sm:$0xf]  ;;  %v1886_v30 = vld [vmem:[%s3849_s4 + $0x68] sm:$0xf] }
  0xb9   :  { %2721 = vset.pattern.permute.xlu1 %v2808_v2  ;;  %v960_v38 = vpop.permute.xlu1 %959 }
  0xba   :  { %v490_v42 = vmul.bf16 %v3113_v29, %v128_v33  ;;  %v968_v50 = vrot.slane %v960_v38, %v3099_v21  ;;  %1047 = vperm.xlu1 %2721, %v3007_v41   ;;  %2544 = vmatpush3.bf16.msra.mxu0 %v2509_v35  ;;  %v1866_v41 = vld [vmem:[%s3849_s4 + $0x18] sm:$0xf]  ;;  %v1319_v33 = vmul.bf16 %v3123_v34, %v1166_v25 }
  0xbb   :  { %2685 = vmatpush3.bf16.msra.mxu1 %v2509_v35  ;;  %v739_v44 = vpop.permute.xlu0 %738 }
  0xbc   :  { %v747_v51 = vrot.slane %v739_v44, %v3099_v21  ;;  %2158 = vperm.xlu0 %2727, %v1882_v39   ;;  %v906_v55 = vadd.bf16 %v555_v47, %v490_v42  ;;  %v1301_v49 = vmul.bf16 %v3123_v34, %v968_v50 }
  0xbd   :  { %v971_v53 = vpop.permute.xlu1 %970 }
  0xbe   :  { %v922_v57 = vadd.bf16 %v747_v51, %v506_v40  ;;  %v979_v59 = vrot.slane %v971_v53, %v3099_v21  ;;  %1058 = vperm.xlu1 %2721, %v3104_v23   ;;  %v1333_v7 = vadd.bf16 %v1301_v49, %v906_v55  ;;  %v1872_v53 = vld [vmem:[%s3849_s4 + $0x30] sm:$0xf] }
  0xbf   :  { %v559_v27 = vpop.permute.xlu0 %558 }
  0xc0   :  { %v1349_v63 = vadd.bf16 %v1317_v45, %v922_v57  ;;  %v567_v0 = vrot.slane %v559_v27, %v3099_v21  ;;  %1966 = vperm.xlu0 %2727, %v1866_v41   ;;  %v1302_v23 = vmul.bf16 %v3123_v34, %v979_v59  ;;  %v1365_v20 = vmax.bf16 %v3853_v3, %v1333_v7 }
  0xc2   :  { %v907_v8 = vadd.bf16 %v567_v0, %v491_v60  ;;  %2722 = vset.pattern.permute.xlu1 %v3853_v3  ;;  %v348_v9 = vpop.permute.xlu1 %347  ;;  %v1381_v10 = vmax.bf16 %v3853_v3, %v1349_v63  ;;  %v1890_v60 = vld [vmem:[%s3849_s4 + $0x78] sm:$0xf] }
  0xc3   :  { %v336_v11 = vpop.permute.xlu0 %335  ;;  %443 = vperm.xlu1 %2722, %v58_v1   ;;  %v356_v54 = vrot.slane %v348_v9, %v3099_v21 }
  0xc4   :  { %v1334_v13 = vadd.bf16 %v1302_v23, %v907_v8  ;;  %2182 = vperm.xlu0 %2727, %v1884_v5   ;;  %v2518_v14 = vcombine.low %v1381_v10, %v1382_v6  ;;  %v344_v18 = vrot.slane %v336_v11, %v3099_v21  ;;  %v1874_v8 = vld [vmem:[%s3849_s4 + $0x38] sm:$0xf] }
  0xc5   :  { %v509_v40 = vmul.bf16 %v3113_v29, %v356_v54 }
  0xc6   :  { %v3220_v16 = vpop.permute.xlu1 %155  ;;  %2545 = vmatprep.subr.bf16.mxu0 %v2518_v14  ;;  %2678 = vmatprep.subr.bf16.mxu1 %v2518_v14  ;;  %v1366_v22 = vmax.bf16 %v3853_v3, %v1334_v13  ;;  %v508_v31 = vmul.bf16 %v3113_v29, %v344_v18  ;;  %v2405_v18 = vld [vmem:[%s3851_s6] sm:$0xff] }
  0xc7   :  { %v144_v24 = vpop.permute.xlu0 %143  ;;  %251 = vperm.xlu1 %2722, %v3214_v15   ;;  %v164_v59 = vrot.slane %v3220_v16, %v3099_v21 }
  0xc8   :  { %1990 = vperm.xlu0 %2727, %v1868_v17   ;;  %v2510_v26 = vcombine.low %v1365_v20, %v1366_v22  ;;  %v152_v41 = vrot.slane %v144_v24, %v3099_v21  ;;  %v60_v17 = vld [vmem:[%s3846_s1 + $0x7c] sm:$0xf] }
  0xc9   :  { %v493_v9 = vmul.bf16 %v3113_v29, %v164_v59 }
  0xca   :  { %v775_v19 = vpop.permute.xlu1 %774  ;;  %2546 = vmatpush3.bf16.msra.mxu0 %v2510_v26  ;;  %2686 = vmatpush3.bf16.msra.mxu1 %v2510_v26  ;;  %v492_v63 = vmul.bf16 %v3113_v29, %v152_v41 }
  0xcb   :  { %v763_v32 = vpop.permute.xlu0 %762  ;;  %870 = vperm.xlu1 %2722, %v90_v28   ;;  %v783_v37 = vrot.slane %v775_v19, %v3099_v21 }
  0xcc   :  { %v771_v35 = vrot.slane %v763_v32, %v3099_v21  ;;  %2206 = vperm.xlu0 %2727, %v1886_v30   ;;  %v1188_v32 = vrot.slane %v3052_v56, %v3099_v21 }
  0xcd   :  { %v925_v44 = vadd.bf16 %v783_v37, %v509_v40 }
  0xce   :  { %v924_v38 = vadd.bf16 %v771_v35, %v508_v31  ;;  %v92_v31 = vld [vmem:[%s3847_s2 + $0x7c] sm:$0xf]  ;;  %v1321_v37 = vmul.bf16 %v3123_v34, %v1188_v32  ;;  %v1863_v32 = vld [vmem:[%s3849_s4 + $0xc] sm:$0xf] }
  0xcf   :  { %2723 = vset.pattern.permute.xlu1 %v2808_v2  ;;  %v1169_v39 = vpop.permute.xlu1 %1168  ;;  %v583_v49 = vpop.permute.xlu0 %582 }
  0xd0   :  { %v1351_v42 = vadd.bf16 %v1319_v33, %v924_v38  ;;  %v1177_v50 = vrot.slane %v1169_v39, %v3099_v21  ;;  %2014 = vperm.xlu0 %2727, %v1870_v36   ;;  %1256 = vperm.xlu1 %2723, %v58_v1   ;;  %v591_v5 = vrot.slane %v583_v49, %v3099_v21 }
  0xd2   :  { %v1320_v45 = vmul.bf16 %v3123_v34, %v1177_v50  ;;  %v1383_v52 = vmax.bf16 %v3853_v3, %v1351_v42 }
  0xd3   :  { %v360_v7 = vpop.permute.xlu0 %359 }
  0xd4   :  { %v1352_v47 = vadd.bf16 %v1320_v45, %v925_v44  ;;  %2230 = vperm.xlu0 %2727, %v1888_v43   ;;  %2724 = vset.pattern.permute.xlu1 %v3853_v3  ;;  %v571_v51 = vpop.permute.xlu1 %570  ;;  %v368_v26 = vrot.slane %v360_v7, %v3099_v21  ;;  %v75_v45 = vld [vmem:[%s3847_s2 + $0x38] sm:$0xf] }
  0xd5   :  { %666 = vperm.xlu1 %2724, %v73_v46   ;;  %v579_v0 = vrot.slane %v571_v51, %v3099_v21 }
  0xd6   :  { %v1384_v55 = vmax.bf16 %v3853_v3, %v1352_v47  ;;  %v510_v33 = vmul.bf16 %v3113_v29, %v368_v26 }
  0xd7   :  { %v908_v10 = vadd.bf16 %v579_v0, %v492_v63  ;;  %v168_v22 = vpop.permute.xlu0 %167 }
  0xd8   :  { %2038 = vperm.xlu0 %2727, %v1872_v53   ;;  %v2519_v57 = vcombine.low %v1383_v52, %v1384_v55  ;;  %v176_v52 = vrot.slane %v168_v22, %v3099_v21 }
  0xd9   :  { %2725 = vset.pattern.permute.xlu1 %v2808_v2  ;;  %v982_v27 = vpop.permute.xlu1 %981 }
  0xda   :  { %v990_v1 = vrot.slane %v982_v27, %v3099_v21  ;;  %1069 = vperm.xlu1 %2725, %v3032_v48   ;;  %2547 = vmatprep.subr.bf16.mxu0 %v2519_v57  ;;  %v909_v48 = vadd.bf16 %v591_v5, %v493_v9  ;;  %v494_v59 = vmul.bf16 %v3113_v29, %v176_v52 }
  0xdb   :  { %2679 = vmatprep.subr.bf16.mxu1 %v2519_v57  ;;  %v787_v19 = vpop.permute.xlu0 %786 }
  0xdc   :  { %v1303_v6 = vmul.bf16 %v3123_v34, %v990_v1  ;;  %2254 = vperm.xlu0 %2727, %v1890_v60   ;;  %v795_v54 = vrot.slane %v787_v19, %v3099_v21 }
  0xdd   :  { %v993_v23 = vpop.permute.xlu1 %992 }
  0xde   :  { %v1001_v11 = vrot.slane %v993_v23, %v3099_v21  ;;  %1080 = vperm.xlu1 %2725, %v3214_v15   ;;  %v1335_v13 = vadd.bf16 %v1303_v6, %v908_v10  ;;  %v44_v15 = vld [vmem:[%s3846_s1 + $0x3c] sm:$0xf]  ;;  %v926_v38 = vadd.bf16 %v795_v54, %v510_v33 }
  0xdf   :  { %v607_v51 = vpop.permute.xlu0 %606 }
  0xe0   :  { %v1304_v14 = vmul.bf16 %v3123_v34, %v1001_v11  ;;  %2062 = vperm.xlu0 %2727, %v1874_v8   ;;  %v1367_v24 = vmax.bf16 %v3853_v3, %v1335_v13  ;;  %v1353_v50 = vadd.bf16 %v1321_v37, %v926_v38  ;;  %v615_v0 = vrot.slane %v607_v51, %v3099_v21  ;;  %v1861_v13 = vld [vmem:[%s3849_s4 + $0x4] sm:$0xf] }
  0xe2   :  { %v1336_v16 = vadd.bf16 %v1304_v14, %v909_v48  ;;  %2726 = vset.pattern.permute.xlu1 %v3853_v3  ;;  %v372_v20 = vpop.permute.xlu1 %371  ;;  %v1385_v53 = vmax.bf16 %v3853_v3, %v1353_v50 }
  0xe3   :  { %467 = vperm.xlu1 %2726, %v60_v17   ;;  %v380_v36 = vrot.slane %v372_v20, %v3099_v21  ;;  %v384_v63 = vpop.permute.xlu0 %383 }
  0xe4   :  { %2408 = vperm.xlu0 %2727, %v2405_v18   ;;  %v1368_v25 = vmax.bf16 %v3853_v3, %v1336_v16  ;;  %v392_v18 = vrot.slane %v384_v63, %v3099_v21  ;;  %v1867_v63 = vld [vmem:[%s3849_s4 + $0x1c] sm:$0xf] }
  0xe5   :  { %v511_v42 = vmul.bf16 %v3113_v29, %v380_v36 }
  0xe6   :  { %v180_v28 = vpop.permute.xlu1 %179  ;;  %v2511_v30 = vcombine.low %v1367_v24, %v1368_v25  ;;  %v2734_v24 = vld [vmem:[%s3848_s3 + $0x4] ss:$8 sps:$4 sm:$0xff]   ;;  %v512_v25 = vmul.bf16 %v3113_v29, %v392_v18 }
  0xe7   :  { %275 = vperm.xlu1 %2726, %v44_v15   ;;  %v188_v55 = vrot.slane %v180_v28, %v3099_v21  ;;  %v192_v10 = vpop.permute.xlu0 %191  ;;  %1715 = vmatprep.mubr.bf16.mxu0 %v2734_v24 }
  0xe8   :  { %2548 = vmatpush3.bf16.msra.mxu0 %v2511_v30  ;;  %2687 = vmatpush3.bf16.msra.mxu1 %v2511_v30  ;;  %v2737_v30 = vld [vmem:[%s3848_s3 + $0x94] ss:$8 sps:$4 sm:$0xff]  }
  0xe9   :  { %v495_v1 = vmul.bf16 %v3113_v29, %v188_v55  ;;  %1787 = vmatprep.mubr.bf16.mxu1 %v2737_v30 }
  0xea   :  { %v799_v35 = vpop.permute.xlu1 %798 }
  0xeb   :  { %894 = vperm.xlu1 %2726, %v92_v31   ;;  %v807_v39 = vrot.slane %v799_v35, %v3099_v21  ;;  %v911_v23 = vadd.bf16 %v615_v0, %v495_v1  ;;  %v811_v22 = vpop.permute.xlu0 %810  ;;  %v1210_v31 = vrot.slane %v3057_v58, %v3099_v21  ;;  %v1881_v58 = vld [vmem:[%s3849_s4 + $0x54] sm:$0xf] }
  0xec   :  { %v819_v26 = vrot.slane %v811_v22, %v3099_v21 }
  0xed   :  { %v927_v43 = vadd.bf16 %v807_v39, %v511_v42  ;;  %v1323_v36 = vmul.bf16 %v3123_v34, %v1210_v31 }
  0xee   :  { %v928_v33 = vadd.bf16 %v819_v26, %v512_v25  ;;  %v1232_v25 = vrot.slane %v3071_v62, %v3099_v21  ;;  %v1889_v62 = vld [vmem:[%s3849_s4 + $0x74] sm:$0xf] }
  0xef   :  { %2728 = vset.pattern.permute.xlu1 %v2808_v2  ;;  %v1191_v40 = vpop.permute.xlu1 %1190 }
  0xf0   :  { %v1199_v56 = vrot.slane %v1191_v40, %v3099_v21  ;;  %1278 = vperm.xlu1 %2728, %v60_v17   ;;  %v1355_v39 = vadd.bf16 %v1323_v36, %v928_v33 }
  0xf2   :  { %v1322_v44 = vmul.bf16 %v3123_v34, %v1199_v56 }
  0xf4   :  { %v1354_v46 = vadd.bf16 %v1322_v44, %v927_v43  ;;  %2729 = vset.pattern.permute.xlu1 %v3853_v3  ;;  %v595_v47 = vpop.permute.xlu1 %594  ;;  %v1865_v43 = vld [vmem:[%s3849_s4 + $0x14] sm:$0xf]  ;;  %v631_v44 = vpop.permute.xlu0 %630 }
  0xf5   :  { %690 = vperm.xlu1 %2729, %v75_v45   ;;  %v603_v27 = vrot.slane %v595_v47, %v3099_v21  ;;  %v1387_v45 = vmax.bf16 %v3853_v3, %v1355_v39  ;;  %v200_v47 = vrot.slane %v192_v10, %v3099_v21  ;;  %v639_v1 = vrot.slane %v631_v44, %v3099_v21  ;;  %v1873_v39 = vld [vmem:[%s3849_s4 + $0x34] sm:$0xf] }
  0xf6   :  { %v1386_v41 = vmax.bf16 %v3853_v3, %v1354_v46 }
  0xf8   :  { %v2520_v49 = vcombine.low %v1385_v53, %v1386_v41  ;;  %v1883_v53 = vld [vmem:[%s3849_s4 + $0x5c] sm:$0xf] }
  0xf9   :  { %2730 = vset.pattern.permute.xlu1 %v2808_v2  ;;  %v1004_v57 = vpop.permute.xlu1 %1003  ;;  %v910_v2 = vadd.bf16 %v603_v27, %v494_v59  ;;  %v496_v59 = vmul.bf16 %v3113_v29, %v200_v47 }
  0xfa   :  { %v1012_v60 = vrot.slane %v1004_v57, %v3099_v21  ;;  %1091 = vperm.xlu1 %2730, %v3069_v61   ;;  %2549 = vmatprep.subr.bf16.mxu0 %v2520_v49  ;;  %v1877_v61 = vld [vmem:[%s3849_s4 + $0x44] sm:$0xf]  ;;  %v408_v57 = vpop.permute.xlu0 %407 }
  0xfb   :  { %2680 = vmatprep.subr.bf16.mxu1 %v2520_v49 }
  0xfc   :  { %v1305_v5 = vmul.bf16 %v3123_v34, %v1012_v60 }
  0xfd   :  { %v1015_v6 = vpop.permute.xlu1 %1014 }
  0xfe   :  { %v1023_v7 = vrot.slane %v1015_v6, %v3099_v21  ;;  %1102 = vperm.xlu1 %2730, %v44_v15   ;;  %v1337_v8 = vadd.bf16 %v1305_v5, %v910_v2  ;;  %v1879_v15 = vld [vmem:[%s3849_s4 + $0x4c] sm:$0xf] }
 0x100   :  { %v1306_v9 = vmul.bf16 %v3123_v34, %v1023_v7  ;;  %v1369_v14 = vmax.bf16 %v3853_v3, %v1337_v8  ;;  %v1885_v8 = vld [vmem:[%s3849_s4 + $0x64] sm:$0xf] }
 0x102   :  { %v1338_v11 = vadd.bf16 %v1306_v9, %v911_v23  ;;  %2731 = vset.pattern.permute.xlu1 %v3853_v3  ;;  %v396_v48 = vpop.permute.xlu1 %395  ;;  %v216_v9 = vpop.permute.xlu0 %215 }
 0x103   :  { %2098 = vperm.xlu1 %2731, %v1877_v61   ;;  %v404_v19 = vrot.slane %v396_v48, %v3099_v21 }
 0x104   :  { %v1370_v17 = vmax.bf16 %v3853_v3, %v1338_v11  ;;  %v1869_v11 = vld [vmem:[%s3849_s4 + $0x24] sm:$0xf] }
 0x105   :  { %v513_v37 = vmul.bf16 %v3113_v29, %v404_v19 }
 0x106   :  { %v204_v16 = vpop.permute.xlu1 %203  ;;  %v2512_v20 = vcombine.low %v1369_v14, %v1370_v17  ;;  %v416_v14 = vrot.slane %v408_v57, %v3099_v21 }
 0x107   :  { %1906 = vperm.xlu1 %2731, %v1861_v13   ;;  %v212_v51 = vrot.slane %v204_v16, %v3099_v21  ;;  %v835_v16 = vpop.permute.xlu0 %834 }
 0x108   :  { %2550 = vmatpush3.bf16.msra.mxu0 %v2512_v20  ;;  %2688 = vmatpush3.bf16.msra.mxu1 %v2512_v20  ;;  %v1887_v20 = vld [vmem:[%s3849_s4 + $0x6c] sm:$0xf]  ;;  %v514_v22 = vmul.bf16 %v3113_v29, %v416_v14 }
 0x109   :  { %v497_v27 = vmul.bf16 %v3113_v29, %v212_v51 }
 0x10a   :  { %v823_v28 = vpop.permute.xlu1 %822 }
 0x10b   :  { %2122 = vperm.xlu1 %2731, %v1879_v15   ;;  %v831_v54 = vrot.slane %v823_v28, %v3099_v21  ;;  %v913_v2 = vadd.bf16 %v639_v1, %v497_v27  ;;  %v843_v15 = vrot.slane %v835_v16, %v3099_v21  ;;  %v1871_v28 = vld [vmem:[%s3849_s4 + $0x2c] sm:$0xf] }
 0x10d   :  { %v929_v40 = vadd.bf16 %v831_v54, %v513_v37  ;;  %v930_v30 = vadd.bf16 %v843_v15, %v514_v22 }
 0x10f   :  { %1930 = vperm.xlu1 %2731, %v1863_v32   ;;  %v1213_v35 = vpop.permute.xlu1 %1212  ;;  %v1325_v32 = vmul.bf16 %v3123_v34, %v1232_v25 }
 0x110   :  { %v1221_v38 = vrot.slane %v1213_v35, %v3099_v21 }
 0x111   :  { %v1357_v35 = vadd.bf16 %v1325_v32, %v930_v30 }
 0x112   :  { %v1324_v42 = vmul.bf16 %v3123_v34, %v1221_v38 }
 0x113   :  { %2146 = vperm.xlu1 %2731, %v1881_v58  }
 0x114   :  { %v1356_v56 = vadd.bf16 %v1324_v42, %v929_v40  ;;  %v619_v50 = vpop.permute.xlu1 %618  ;;  %v655_v40 = vpop.permute.xlu0 %654  ;;  %v1389_v42 = vmax.bf16 %v3853_v3, %v1357_v35 }
 0x115   :  { %v627_v55 = vrot.slane %v619_v50, %v3099_v21  ;;  %v224_v50 = vrot.slane %v216_v9, %v3099_v21 }
 0x116   :  { %v1388_v46 = vmax.bf16 %v3853_v3, %v1356_v56 }
 0x117   :  { %1954 = vperm.xlu1 %2731, %v1865_v43   ;;  %v912_v5 = vadd.bf16 %v627_v55, %v496_v59  ;;  %v663_v59 = vrot.slane %v655_v40, %v3099_v21 }
 0x118   :  { %v2521_v52 = vcombine.low %v1387_v45, %v1388_v46  ;;  %v1891_v45 = vld [vmem:[%s3849_s4 + $0x7c] sm:$0xf] }
 0x119   :  { %v1026_v41 = vpop.permute.xlu1 %1025 }
 0x11a   :  { %v1034_v49 = vrot.slane %v1026_v41, %v3099_v21  ;;  %2551 = vmatprep.subr.bf16.mxu0 %v2521_v52  ;;  %2681 = vmatprep.subr.bf16.mxu1 %v2521_v52  ;;  %v432_v52 = vpop.permute.xlu0 %431 }
 0x11b   :  { %2170 = vperm.xlu1 %2731, %v1883_v53   ;;  %v498_v53 = vmul.bf16 %v3113_v29, %v224_v50 }
 0x11c   :  { %v1307_v60 = vmul.bf16 %v3123_v34, %v1034_v49  ;;  %v1875_v49 = vld [vmem:[%s3849_s4 + $0x3c] sm:$0xf] }
 0x11d   :  { %v1037_v0 = vpop.permute.xlu1 %1036 }
 0x11e   :  { %v1045_v6 = vrot.slane %v1037_v0, %v3099_v21  ;;  %v1339_v7 = vadd.bf16 %v1307_v60, %v912_v5  ;;  %v240_v5 = vpop.permute.xlu0 %239 }
 0x11f   :  { %1978 = vperm.xlu1 %2731, %v1867_v63  }
 0x120   :  { %v1308_v23 = vmul.bf16 %v3123_v34, %v1045_v6  ;;  %v1371_v48 = vmax.bf16 %v3853_v3, %v1339_v7 }
 0x122   :  { %v1340_v61 = vadd.bf16 %v1308_v23, %v913_v2  ;;  %v420_v10 = vpop.permute.xlu1 %419 }
 0x123   :  { %2194 = vperm.xlu1 %2731, %v1885_v8   ;;  %v428_v26 = vrot.slane %v420_v10, %v3099_v21  ;;  %v440_v10 = vrot.slane %v432_v52, %v3099_v21 }
 0x124   :  { %v1372_v13 = vmax.bf16 %v3853_v3, %v1340_v61  ;;  %v859_v61 = vpop.permute.xlu0 %858 }
 0x125   :  { %v515_v33 = vmul.bf16 %v3113_v29, %v428_v26  ;;  %v516_v14 = vmul.bf16 %v3113_v29, %v440_v10 }
 0x126   :  { %v228_v17 = vpop.permute.xlu1 %227  ;;  %v2513_v18 = vcombine.low %v1371_v48, %v1372_v13  ;;  %v1254_v13 = vrot.slane %v3078_v4, %v3099_v21 }
 0x127   :  { %2002 = vperm.xlu1 %2731, %v1869_v11   ;;  %v236_v43 = vrot.slane %v228_v17, %v3099_v21  ;;  %v867_v11 = vrot.slane %v859_v61, %v3099_v21 }
 0x128   :  { %2552 = vmatpush3.bf16.msra.mxu0 %v2513_v18  ;;  %2689 = vmatpush3.bf16.msra.mxu1 %v2513_v18  ;;  %v1327_v22 = vmul.bf16 %v3123_v34, %v1254_v13 }
 0x129   :  { %v499_v41 = vmul.bf16 %v3113_v29, %v236_v43  ;;  %v932_v18 = vadd.bf16 %v867_v11, %v516_v14 }
 0x12a   :  { %v847_v24 = vpop.permute.xlu1 %846 }
 0x12b   :  { %2218 = vperm.xlu1 %2731, %v1887_v20   ;;  %v855_v31 = vrot.slane %v847_v24, %v3099_v21  ;;  %v915_v63 = vadd.bf16 %v663_v59, %v499_v41  ;;  %v1359_v25 = vadd.bf16 %v1327_v22, %v932_v18 }
 0x12d   :  { %v931_v36 = vadd.bf16 %v855_v31, %v515_v33  ;;  %v679_v31 = vpop.permute.xlu0 %678  ;;  %v248_v33 = vrot.slane %v240_v5, %v3099_v21 }
 0x12f   :  { %2026 = vperm.xlu1 %2731, %v1871_v28   ;;  %v1235_v19 = vpop.permute.xlu1 %1234 }
 0x130   :  { %v1243_v54 = vrot.slane %v1235_v19, %v3099_v21  ;;  %v1391_v19 = vmax.bf16 %v3853_v3, %v1359_v25 }
 0x132   :  { %v1326_v37 = vmul.bf16 %v3123_v34, %v1243_v54 }
 0x133   :  { %2242 = vperm.xlu1 %2731, %v1889_v62  }
 0x134   :  { %v1358_v38 = vadd.bf16 %v1326_v37, %v931_v36  ;;  %v643_v58 = vpop.permute.xlu1 %642 }
 0x135   :  { %v651_v47 = vrot.slane %v643_v58, %v3099_v21  ;;  %v500_v58 = vmul.bf16 %v3113_v29, %v248_v33 }
 0x136   :  { %v1390_v56 = vmax.bf16 %v3853_v3, %v1358_v38  ;;  %v456_v38 = vpop.permute.xlu0 %455 }
 0x137   :  { %2050 = vperm.xlu1 %2731, %v1873_v39   ;;  %v914_v27 = vadd.bf16 %v651_v47, %v498_v53  ;;  %v464_v59 = vrot.slane %v456_v38, %v3099_v21  ;;  %v2740_v38 = vld [vmem:[%s3848_s3 + $0xa4] ss:$8 sps:$4 sm:$0xff]  }
 0x138   :  { %v2522_v44 = vcombine.low %v1389_v42, %v1390_v56  ;;  %v687_v56 = vrot.slane %v679_v31, %v3099_v21 }
 0x139   :  { %v1048_v46 = vpop.permute.xlu1 %1047 }
 0x13a   :  { %v1056_v51 = vrot.slane %v1048_v46, %v3099_v21  ;;  %2553 = vmatprep.subr.bf16.mxu0 %v2522_v44  ;;  %2682 = vmatprep.subr.bf16.mxu1 %v2522_v44  ;;  %v264_v47 = vpop.permute.xlu0 %263 }
 0x13b   :  { %2266 = vperm.xlu1 %2731, %v1891_v45   ;;  %v272_v14 = vrot.slane %v264_v47, %v3099_v21  ;;  %v2756_v47 = vld [vmem:[%s3848_s3 + $0x44] ss:$8 sps:$4 sm:$0xff]  }
 0x13c   :  { %v1309_v55 = vmul.bf16 %v3123_v34, %v1056_v51 }
 0x13d   :  { %v1059_v57 = vpop.permute.xlu1 %1058 }
 0x13e   :  { %v1067_v60 = vrot.slane %v1059_v57, %v3099_v21  ;;  %v1341_v0 = vadd.bf16 %v1309_v55, %v914_v27  ;;  %v883_v57 = vpop.permute.xlu0 %882 }
 0x13f   :  { %2074 = vperm.xlu1 %2731, %v1875_v49   ;;  %v891_v27 = vrot.slane %v883_v57, %v3099_v21  ;;  %v2767_v57 = vld [vmem:[%s3848_s3 + $0xe0] ss:$8 sps:$4 sm:$0xff]  }
 0x140   :  { %v1310_v1 = vmul.bf16 %v3123_v34, %v1067_v60  ;;  %v1373_v7 = vmax.bf16 %v3853_v3, %v1341_v0  ;;  %v518_v0 = vmul.bf16 %v3113_v29, %v464_v59  ;;  %v2768_v59 = vld [vmem:[%s3848_s3 + $0x64] ss:$8 sps:$4 sm:$0xff]  }
 0x142   :  { %v1342_v6 = vadd.bf16 %v1310_v1, %v915_v63  ;;  %v444_v2 = vpop.permute.xlu1 %443  ;;  %v1276_v63 = vrot.slane %v3088_v12, %v3099_v21  ;;  %v934_v5 = vadd.bf16 %v891_v27, %v518_v0  ;;  %v2770_v27 = vld [vmem:[%s3848_s3 + $0xf4] ss:$8 sps:$4 sm:$0xff]  }
 0x143   :  { %v452_v17 = vrot.slane %v444_v2, %v3099_v21  ;;  %v2774_v0 = vld [vmem:[%s3848_s3 + $0x74] ss:$8 sps:$4 sm:$0xff]  }
 0x144   :  { %v1374_v23 = vmax.bf16 %v3853_v3, %v1342_v6 }
 0x145   :  { %v517_v15 = vmul.bf16 %v3113_v29, %v452_v17 }
 0x146   :  { %v252_v8 = vpop.permute.xlu1 %251  ;;  %v2514_v9 = vcombine.low %v1373_v7, %v1374_v23  ;;  %v1329_v7 = vmul.bf16 %v3123_v34, %v1276_v63  ;;  %v2773_v63 = vld [vmem:[%s3848_s3 + $0xf0] ss:$8 sps:$4 sm:$0xff]  }
 0x147   :  { %v260_v54 = vrot.slane %v252_v8, %v3099_v21 }
 0x148   :  { %2554 = vmatpush3.bf16.msra.mxu0 %v2514_v9  ;;  %2690 = vmatpush3.bf16.msra.mxu1 %v2514_v9  ;;  %v1361_v9 = vadd.bf16 %v1329_v7, %v934_v5  ;;  %v2777_v5 = vld [vmem:[%s3848_s3 + $0x84] ss:$8 sps:$4 sm:$0xff]  }
 0x149   :  { %v501_v39 = vmul.bf16 %v3113_v29, %v260_v54 }
 0x14a   :  { %v871_v48 = vpop.permute.xlu1 %870 }
 0x14b   :  { %v879_v16 = vrot.slane %v871_v48, %v3099_v21  ;;  %v917_v44 = vadd.bf16 %v687_v56, %v501_v39  ;;  %v1393_v48 = vmax.bf16 %v3853_v3, %v1361_v9  ;;  %v2743_v39 = vld [vmem:[%s3848_s3 + $0xa0] ss:$8 sps:$4 sm:$0xff]  }
 0x14c   :  { %v2748_v56 = vld [vmem:[%s3848_s3 + $0x20] ss:$8 sps:$4 sm:$0xff]  }
 0x14d   :  { %v933_v26 = vadd.bf16 %v879_v16, %v517_v15  ;;  %v703_v15 = vpop.permute.xlu0 %702 }
 0x14f   :  { %v1257_v20 = vpop.permute.xlu1 %1256 }
 0x150   :  { %v1265_v24 = vrot.slane %v1257_v20, %v3099_v21 }
 0x152   :  { %v1328_v28 = vmul.bf16 %v3123_v34, %v1265_v24  ;;  %v502_v24 = vmul.bf16 %v3113_v29, %v272_v14 }
 0x154   :  { %v1360_v30 = vadd.bf16 %v1328_v28, %v933_v26  ;;  %v667_v4 = vpop.permute.xlu1 %666 }
 0x155   :  { %v675_v36 = vrot.slane %v667_v4, %v3099_v21 }
 0x156   :  { %v1392_v32 = vmax.bf16 %v3853_v3, %v1360_v30  ;;  %v711_v30 = vrot.slane %v703_v15, %v3099_v21 }
 0x157   :  { %v916_v50 = vadd.bf16 %v675_v36, %v500_v58  ;;  %v2742_v58 = vld [vmem:[%s3848_s3 + $0x10] ss:$8 sps:$4 sm:$0xff]  }
 0x158   :  { %v2523_v62 = vcombine.low %v1391_v19, %v1392_v32 }
 0x159   :  { %v1070_v35 = vpop.permute.xlu1 %1069 }
 0x15a   :  { %v1078_v37 = vrot.slane %v1070_v35, %v3099_v21  ;;  %2555 = vmatprep.subr.bf16.mxu0 %v2523_v62  ;;  %2683 = vmatprep.subr.bf16.mxu1 %v2523_v62 }
 0x15c   :  { %v1311_v40 = vmul.bf16 %v3123_v34, %v1078_v37  ;;  %v2735_v37 = vld [vmem:[%s3848_s3 + $0x90] ss:$8 sps:$4 sm:$0xff]  }
 0x15d   :  { %v1081_v42 = vpop.permute.xlu1 %1080 }
 0x15e   :  { %v1089_v43 = vrot.slane %v1081_v42, %v3099_v21  ;;  %v1343_v45 = vadd.bf16 %v1311_v40, %v916_v50  ;;  %v2744_v40 = vld [vmem:[%s3848_s3 + $0x24] ss:$8 sps:$4 sm:$0xff]   ;;  %v2746_v42 = vld [vmem:[%s3848_s3 + $0xb4] ss:$8 sps:$4 sm:$0xff]   ;;  %v2749_v50 = vld [vmem:[%s3848_s3 + $0xb0] ss:$8 sps:$4 sm:$0xff]  }
 0x160   :  { %v1312_v46 = vmul.bf16 %v3123_v34, %v1089_v43  ;;  %v1375_v53 = vmax.bf16 %v3853_v3, %v1343_v45  ;;  %v2750_v43 = vld [vmem:[%s3848_s3 + $0x34] ss:$8 sps:$4 sm:$0xff]   ;;  %v2754_v45 = vld [vmem:[%s3848_s3 + $0x30] ss:$8 sps:$4 sm:$0xff]  }
 0x162   :  { %v1344_v51 = vadd.bf16 %v1312_v46, %v917_v44  ;;  %v468_v52 = vpop.permute.xlu1 %467  ;;  %v2752_v44 = vld [vmem:[%s3848_s3 + $0xc4] ss:$8 sps:$4 sm:$0xff]   ;;  %v2755_v46 = vld [vmem:[%s3848_s3 + $0xc0] ss:$8 sps:$4 sm:$0xff]  }
 0x163   :  { %v476_v1 = vrot.slane %v468_v52, %v3099_v21  ;;  %v2760_v52 = vld [vmem:[%s3848_s3 + $0x40] ss:$8 sps:$4 sm:$0xff]  }
 0x164   :  { %v1376_v41 = vmax.bf16 %v3853_v3, %v1344_v51  ;;  %v2758_v51 = vld [vmem:[%s3848_s3 + $0xd4] ss:$8 sps:$4 sm:$0xff]  }
 0x165   :  { %v519_v23 = vmul.bf16 %v3113_v29, %v476_v1  ;;  %v2776_v1 = vld [vmem:[%s3848_s3 + $0x70] ss:$8 sps:$4 sm:$0xff]  }
 0x166   :  { %v276_v55 = vpop.permute.xlu1 %275  ;;  %v2515_v49 = vcombine.low %v1375_v53, %v1376_v41  ;;  %v2761_v53 = vld [vmem:[%s3848_s3 + $0xd0] ss:$8 sps:$4 sm:$0xff]   ;;  %v2762_v41 = vld [vmem:[%s3848_s3 + $0x54] ss:$8 sps:$4 sm:$0xff]  }
 0x167   :  { %v284_v17 = vrot.slane %v276_v55, %v3099_v21  ;;  %v2764_v55 = vld [vmem:[%s3848_s3 + $0xe4] ss:$8 sps:$4 sm:$0xff]  }
 0x168   :  { %2556 = vmatpush3.bf16.msra.mxu0 %v2515_v49  ;;  %2691 = vmatpush3.bf16.msra.mxu1 %v2515_v49  ;;  %v2766_v49 = vld [vmem:[%s3848_s3 + $0x50] ss:$8 sps:$4 sm:$0xff]  }
 0x169   :  { %v503_v25 = vmul.bf16 %v3113_v29, %v284_v17  ;;  %v2732_v29 = vld [vmem:[%s3848_s3] ss:$8 sps:$4 sm:$0xff]  }
 0x16a   :  { %v895_v60 = vpop.permute.xlu1 %894 }
 0x16b   :  { %v903_v6 = vrot.slane %v895_v60, %v3099_v21  ;;  %v919_v19 = vadd.bf16 %v711_v30, %v503_v25  ;;  %v2772_v60 = vld [vmem:[%s3848_s3 + $0x60] ss:$8 sps:$4 sm:$0xff]  }
 0x16d   :  { %v935_v61 = vadd.bf16 %v903_v6, %v519_v23  ;;  %v2779_v6 = vld [vmem:[%s3848_s3 + $0x80] ss:$8 sps:$4 sm:$0xff]   ;;  %v3576_v23 = vpop.permute.xlu0 %2086 }
 0x16f   :  { %v1279_v2 = vpop.permute.xlu1 %1278 }
 0x170   :  { %v1287_v8 = vrot.slane %v1279_v2, %v3099_v21  ;;  %v3572_v2 = vld [vmem:[%s3850_s5] sm:$0xff] }
 0x171   :  { %3860 = vst [vmem:[#allocation5_spill] sm:$0xff] %v3572_v2  ;;  %v2542_v7 = vcombine.high %v3572_v2, %v3572_v2  ;;  %v3580_v9 = vpop.permute.xlu0 %1894 }
 0x172   :  { %v1330_v10 = vmul.bf16 %v3123_v34, %v1287_v8 }
 0x174   :  { %v1362_v11 = vadd.bf16 %v1330_v10, %v935_v61  ;;  %v691_v12 = vpop.permute.xlu1 %690 }
 0x175   :  { %v699_v20 = vrot.slane %v691_v12, %v3099_v21  ;;  %v3584_v10 = vpop.permute.xlu0 %2110 }
 0x176   :  { %v1394_v13 = vmax.bf16 %v3853_v3, %v1362_v11 }
 0x177   :  { %v918_v4 = vadd.bf16 %v699_v20, %v502_v24 }
 0x178   :  { %v2524_v18 = vcombine.low %v1393_v48, %v1394_v13 }
 0x179   :  { %v1092_v16 = vpop.permute.xlu1 %1091  ;;  %v3600_v30 = vpop.permute.xlu0 %1918 }
 0x17a   :  { %v1100_v22 = vrot.slane %v1092_v16, %v3099_v21  ;;  %2557 = vmatprep.subr.bf16.mxu0 %v2524_v18  ;;  %2684 = vmatprep.subr.bf16.mxu1 %v2524_v18 }
 0x17c   :  { %v1313_v26 = vmul.bf16 %v3123_v34, %v1100_v22 }
 0x17d   :  { %v1103_v28 = vpop.permute.xlu1 %1102 }
 0x17e   :  { %v1111_v31 = vrot.slane %v1103_v28, %v3099_v21  ;;  %v1345_v32 = vadd.bf16 %v1313_v26, %v918_v4  ;;  %v1903_v26 = vrot.slane %v3580_v9, %v3099_v21 }
 0x180   :  { %v1314_v33 = vmul.bf16 %v3123_v34, %v1111_v31  ;;  %v1377_v62 = vmax.bf16 %v3853_v3, %v1345_v32  ;;  %v2738_v34 = vld [vmem:[%s3848_s3 + $0x14] ss:$8 sps:$4 sm:$0xff]   ;;  %s2811_s3 = smov [#allocation2]  }
 0x181   :  { %s2467_s5 = sshll.u32 %s2811_s3, 4  ;;  %s2468_s5 = int_to_ptr.vmem [resolvable:$true] %s2467_s5 }
 0x182   :  { %v1346_v54 = vadd.bf16 %v1314_v33, %v919_v19  ;;  %v3578_v8 = vpop.permute.xlu1 %2098  ;;  %s2784_s12 = scalar_lea.vmem %s2468_s5, 128  ;;  %p2789_p1 = scmp.lt.s32.totalorder %s2468_s5, %s2468_s5 }
 0x183   :  { %p2785_p0 = scmp.ne.s32.totalorder %s2468_s5, %s2784_s12  ;;  %p2790_p2 = scmp.lt.s32.totalorder %s2784_s12, %s2784_s12 }
 0x184   :  { %v1378_v35 = vmax.bf16 %v3853_v3, %v1346_v54 }
 0x185   :  { %p2791_p3 = por %p2790_p2, %p2789_p1 }
 0x186   :  { %v2516_v36 = vcombine.low %v1377_v62, %v1378_v35  ;;  %v3582_v61 = vpop.permute.xlu1 %1906 }
 0x187   :  { %p2792_p4 = pnand %p2791_p3, %p2785_p0 }
 0x188   :  { %2558 = vmatpush3.bf16.msra.mxu0 %v2516_v36  ;;  %2692 = vmatpush3.bf16.msra.mxu1 %v2516_v36 }
 0x18a   :  { %v3586_v11 = vpop.permute.xlu1 %2122 }
 0x18b   :  { %1716 = vmatmul.mubr.bf16.vlgmr.msra.gmra.mrb[0].mxu0 %v2732_v29  ;;  %1788 = vmatmul.mubr.bf16.vlgmr.msra.gmra.mrb[0].mxu1 %v2735_v37 }
 0x18c   :  { %1723 = vmatprep.mubr.bf16.mxu0 %v2738_v34  ;;  %1795 = vmatprep.mubr.bf16.mxu1 %v2740_v38 }
 0x18e   :  { %v3602_v4 = vpop.permute.xlu1 %1930 }
 0x193   :  { %1724 = vmatmul.mubr.bf16.gmra.mrb[4].mxu0 %v2742_v58  ;;  %1796 = vmatmul.mubr.bf16.gmra.mrb[4].mxu1 %v2743_v39 }
 0x194   :  { %1731 = vmatprep.mubr.bf16.mxu0 %v2744_v40  ;;  %1803 = vmatprep.mubr.bf16.mxu1 %v2746_v42  ;;  %v3616_v40 = vpop.permute.xlu0 %2134  ;;  %v3618_v42 = vpop.permute.xlu1 %2146 }
 0x19b   :  { %1732 = vmatmul.mubr.bf16.gmra.mrb[8].mxu0 %v2748_v56  ;;  %1804 = vmatmul.mubr.bf16.gmra.mrb[8].mxu1 %v2749_v50 }
 0x19c   :  { %1739 = vmatprep.mubr.bf16.mxu0 %v2750_v43  ;;  %1811 = vmatprep.mubr.bf16.mxu1 %v2752_v44 }
 0x1a3   :  { %1740 = vmatmul.mubr.bf16.gmra.mrb[12].mxu0 %v2754_v45  ;;  %1812 = vmatmul.mubr.bf16.gmra.mrb[12].mxu1 %v2755_v46 }
 0x1a4   :  { %1747 = vmatprep.mubr.bf16.mxu0 %v2756_v47  ;;  %1819 = vmatprep.mubr.bf16.mxu1 %v2758_v51 }
 0x1ab   :  { %1748 = vmatmul.mubr.bf16.gmra.mrb[16].mxu0 %v2760_v52  ;;  %1820 = vmatmul.mubr.bf16.gmra.mrb[16].mxu1 %v2761_v53 }
 0x1ac   :  { %1755 = vmatprep.mubr.bf16.mxu0 %v2762_v41  ;;  %1827 = vmatprep.mubr.bf16.mxu1 %v2764_v55 }
 0x1b3   :  { %1756 = vmatmul.mubr.bf16.gmra.mrb[20].mxu0 %v2766_v49  ;;  %1828 = vmatmul.mubr.bf16.gmra.mrb[20].mxu1 %v2767_v57  ;;  %v1915_v49 = vrot.slane %v3582_v61, %v3099_v21  ;;  %v2119_v61 = vrot.slane %v3584_v10, %v3099_v21 }
 0x1b4   :  { %1763 = vmatprep.mubr.bf16.mxu0 %v2768_v59  ;;  %1835 = vmatprep.mubr.bf16.mxu1 %v2770_v27  ;;  %v3632_v59 = vpop.permute.xlu0 %1942  ;;  %v3634_v27 = vpop.permute.xlu1 %1954 }
 0x1bb   :  { %1764 = vmatmul.mubr.bf16.gmra.mrb[24].mxu0 %v2772_v60  ;;  %1836 = vmatmul.mubr.bf16.gmra.mrb[24].mxu1 %v2773_v63 }
 0x1bc   :  { %1771 = vmatprep.mubr.bf16.mxu0 %v2774_v0  ;;  %2450 = vmatprep.mubr.bf16.mxu1 %v2542_v7 }
 0x1c3   :  { %1772 = vmatmul.mubr.bf16.gmra.mrb[28].mxu0 %v2776_v1 }
 0x1c4   :  { %1779 = vmatprep.mubr.bf16.mxu0 %v2777_v5 }
 0x1cb   :  { %1780 = vmatmul.mubr.bf16.gmra.mrb[32].mxu0 %v2779_v6 }
 0x25e   :  { %v2559_v12 = vpop.f32.mrb[0].mxu0  ;;  %v2613_v48 = vpop.f32.mrb[0].mxu1 }
 0x25f   :  { %v2560_v13 = vpop.f32.mrb[1].mxu0  ;;  %v2614_v14 = vpop.f32.mrb[1].mxu1 }
 0x260   :  { %v3588_v17 = vadd.f32 %v2560_v13, %v2559_v12  ;;  %v3590_v18 = vadd.f32 %v2614_v14, %v2613_v48  ;;  %v2562_v16 = vpop.f32.mrb[2].mxu0  ;;  %v2616_v20 = vpop.f32.mrb[2].mxu1 }
 0x261   :  { %v2563_v22 = vpop.f32.mrb[3].mxu0  ;;  %v2617_v15 = vpop.f32.mrb[3].mxu1 }
 0x262   :  { %v3592_v24 = vadd.f32 %v2563_v22, %v2562_v16  ;;  %v3594_v25 = vadd.f32 %v2617_v15, %v2616_v20  ;;  %v3648_v15 = vpop.permute.xlu0 %2158 }
 0x266   :  { %v2565_v31 = vpop.f32.mrb[4].mxu0  ;;  %v2619_v19 = vpop.f32.mrb[4].mxu1 }
 0x267   :  { %v2566_v32 = vpop.f32.mrb[5].mxu0  ;;  %v2620_v33 = vpop.f32.mrb[5].mxu1 }
 0x268   :  { %v3604_v54 = vadd.f32 %v2566_v32, %v2565_v31  ;;  %v3606_v62 = vadd.f32 %v2620_v33, %v2619_v19  ;;  %v2568_v35 = vpop.f32.mrb[6].mxu0  ;;  %v2622_v36 = vpop.f32.mrb[6].mxu1 }
 0x269   :  { %v2569_v29 = vpop.f32.mrb[7].mxu0  ;;  %v2623_v37 = vpop.f32.mrb[7].mxu1 }
 0x26a   :  { %v3608_v34 = vadd.f32 %v2569_v29, %v2568_v35  ;;  %v3610_v38 = vadd.f32 %v2623_v37, %v2622_v36  ;;  %v3650_v31 = vpop.permute.xlu1 %2170 }
 0x26e   :  { %v2571_v56 = vpop.f32.mrb[8].mxu0  ;;  %v2625_v50 = vpop.f32.mrb[8].mxu1 }
 0x26f   :  { %v2572_v43 = vpop.f32.mrb[9].mxu0  ;;  %v2626_v44 = vpop.f32.mrb[9].mxu1 }
 0x270   :  { %v3620_v45 = vadd.f32 %v2572_v43, %v2571_v56  ;;  %v3622_v46 = vadd.f32 %v2626_v44, %v2625_v50  ;;  %v2574_v47 = vpop.f32.mrb[10].mxu0  ;;  %v2628_v51 = vpop.f32.mrb[10].mxu1 }
 0x271   :  { %v2575_v52 = vpop.f32.mrb[11].mxu0  ;;  %v2629_v53 = vpop.f32.mrb[11].mxu1 }
 0x272   :  { %v3624_v41 = vadd.f32 %v2575_v52, %v2574_v47  ;;  %v3626_v55 = vadd.f32 %v2629_v53, %v2628_v51  ;;  %v3664_v53 = vpop.permute.xlu0 %1966 }
 0x276   :  { %v2577_v60 = vpop.f32.mrb[12].mxu0  ;;  %v2631_v63 = vpop.f32.mrb[12].mxu1 }
 0x277   :  { %v2578_v0 = vpop.f32.mrb[13].mxu0  ;;  %v2632_v1 = vpop.f32.mrb[13].mxu1 }
 0x278   :  { %v3636_v5 = vadd.f32 %v2578_v0, %v2577_v60  ;;  %v3638_v6 = vadd.f32 %v2632_v1, %v2631_v63  ;;  %v2580_v7 = vpop.f32.mrb[14].mxu0  ;;  %v2634_v12 = vpop.f32.mrb[14].mxu1 }
 0x279   :  { %v2581_v48 = vpop.f32.mrb[15].mxu0  ;;  %v2635_v13 = vpop.f32.mrb[15].mxu1 }
 0x27a   :  { %v3640_v14 = vadd.f32 %v2581_v48, %v2580_v7  ;;  %v3642_v16 = vadd.f32 %v2635_v13, %v2634_v12  ;;  %v3666_v60 = vpop.permute.xlu1 %1978 }
 0x27e   :  { %v2583_v19 = vpop.f32.mrb[16].mxu0  ;;  %v2637_v32 = vpop.f32.mrb[16].mxu1 }
 0x27f   :  { %v2584_v33 = vpop.f32.mrb[17].mxu0  ;;  %v2638_v35 = vpop.f32.mrb[17].mxu1 }
 0x280   :  { %v3652_v36 = vadd.f32 %v2584_v33, %v2583_v19  ;;  %v3654_v29 = vadd.f32 %v2638_v35, %v2637_v32  ;;  %v2586_v37 = vpop.f32.mrb[18].mxu0  ;;  %v2640_v56 = vpop.f32.mrb[18].mxu1 }
 0x281   :  { %v2587_v50 = vpop.f32.mrb[19].mxu0  ;;  %v2641_v43 = vpop.f32.mrb[19].mxu1 }
 0x282   :  { %v3656_v44 = vadd.f32 %v2587_v50, %v2586_v37  ;;  %v3658_v47 = vadd.f32 %v2641_v43, %v2640_v56  ;;  %v3680_v43 = vpop.permute.xlu0 %2182 }
 0x286   :  { %v2589_v63 = vpop.f32.mrb[20].mxu0  ;;  %v2643_v0 = vpop.f32.mrb[20].mxu1 }
 0x287   :  { %v2590_v1 = vpop.f32.mrb[21].mxu0  ;;  %v2644_v7 = vpop.f32.mrb[21].mxu1 }
 0x288   :  { %v3668_v12 = vadd.f32 %v2590_v1, %v2589_v63  ;;  %v3670_v48 = vadd.f32 %v2644_v7, %v2643_v0  ;;  %v2592_v13 = vpop.f32.mrb[22].mxu0  ;;  %v2646_v19 = vpop.f32.mrb[22].mxu1 }
 0x289   :  { %v2593_v32 = vpop.f32.mrb[23].mxu0  ;;  %v2647_v33 = vpop.f32.mrb[23].mxu1 }
 0x28a   :  { %v3672_v35 = vadd.f32 %v2593_v32, %v2592_v13  ;;  %v3674_v37 = vadd.f32 %v2647_v33, %v2646_v19  ;;  %v3682_v63 = vpop.permute.xlu1 %2194 }
 0x28e   :  { %v2595_v0 = vpop.f32.mrb[24].mxu0  ;;  %v2649_v1 = vpop.f32.mrb[24].mxu1 }
 0x28f   :  { %v2596_v7 = vpop.f32.mrb[25].mxu0  ;;  %v2650_v52 = vpop.f32.mrb[25].mxu1 }
 0x290   :  { %v3684_v51 = vadd.f32 %v2596_v7, %v2595_v0  ;;  %v3686_v13 = vadd.f32 %v2650_v52, %v2649_v1  ;;  %v2598_v19 = vpop.f32.mrb[26].mxu0  ;;  %v2652_v32 = vpop.f32.mrb[26].mxu1 }
 0x291   :  { %v2599_v33 = vpop.f32.mrb[27].mxu0  ;;  %v2653_v22 = vpop.f32.mrb[27].mxu1 }
 0x292   :  { %3861 = vst [vmem:[#allocation6_spill] sm:$0xff] %v3686_v13  ;;  %v3688_v56 = vadd.f32 %v2599_v33, %v2598_v19  ;;  %v3690_v20 = vadd.f32 %v2653_v22, %v2652_v32  ;;  %v3692_v50 = vpop.permute.xlu1 %2002  ;;  %v3698_v0 = vpop.permute.xlu0 %1990  ;;  %v2095_v33 = vrot.slane %v3576_v23, %v3099_v21  ;;  %v3865_v23 = vpack.c.bf16 %v3592_v24, %v3588_v17 }
 0x293   :  { %v3867_v17 = vmov 0  }
 0x294   :  { %3862 = vst [vmem:[#allocation7_spill] sm:$0xff] %v3690_v20  ;;  %v1927_v20 = vrot.slane %v3600_v30, %v3099_v21  ;;  %v2179_v30 = vrot.slane %v3650_v31, %v3099_v21 }
 0x296   :  { %v2601_v52 = vpop.f32.mrb[28].mxu0  ;;  %v3702_v19 = vpop.permute.xlu1 %2218 }
 0x297   :  { %v2602_v1 = vpop.f32.mrb[29].mxu0  ;;  %v3706_v32 = vpop.permute.xlu0 %2206 }
 0x298   :  { %v3700_v7 = vadd.f32 %v2602_v1, %v2601_v52  ;;  %v2604_v39 = vpop.f32.mrb[30].mxu0  ;;  %v2107_v52 = vrot.slane %v3578_v8, %v3099_v21  ;;  %v2131_v1 = vrot.slane %v3586_v11, %v3099_v21  ;;  %v1939_v11 = vrot.slane %v3602_v4, %v3099_v21 }
 0x299   :  { %v2605_v58 = vpop.f32.mrb[31].mxu0  ;;  %v3866_v4 = vpack.c.bf16 %v3594_v25, %v3590_v18  ;;  %v3868_v18 = vpack.c.bf16 %v3608_v34, %v3604_v54  ;;  %v2203_v54 = vrot.slane %v3682_v63, %v3099_v21 }
 0x29a   :  { %3863 = vst [vmem:[#allocation8_spill] sm:$0xff] %v3700_v7  ;;  %v3704_v22 = vadd.f32 %v2605_v58, %v2604_v39  ;;  %v3716_v28 = vpop.permute.xlu1 %2026  ;;  %v2533_v13 = vcombine.low %v2095_v33, %v2107_v52  ;;  %v2526_v52 = vcombine.low %v1927_v20, %v1939_v11  ;;  %v2167_v20 = vrot.slane %v3648_v15, %v3099_v21 }
 0x29b   :  { %v3724_v7 = vpop.permute.xlu0 %2014  ;;  %v1975_v15 = vrot.slane %v3664_v53, %v3099_v21  ;;  %v2191_v11 = vrot.slane %v3680_v43, %v3099_v21  ;;  %v2011_v53 = vrot.slane %v3692_v50, %v3099_v21  ;;  %v3873_v50 = vpack.c.bf16 %v3642_v16, %v3638_v6 }
 0x29c   :  { %3864 = vst [vmem:[#allocation9_spill] sm:$0xff] %v3704_v22  ;;  %v2525_v22 = vcombine.low %v1903_v26, %v1915_v49  ;;  %v2373_v25 = vadd.bf16 %v2526_v52, %v3868_v18  ;;  %v3874_v6 = vpack.c.bf16 %v3656_v44, %v3652_v36 }
 0x29e   :  { %v2607_v57 = vpop.f32.mrb[32].mxu0  ;;  %v2372_v10 = vadd.bf16 %v2525_v22, %v3865_v23  ;;  %v2243_v26 = vpop.permute.xlu1 %2242  ;;  %v2537_v23 = vcombine.low %v2191_v11, %v2203_v54  ;;  %v3879_v54 = vld [vmem:[#allocation7_spill] sm:$0xff] }
 0x29f   :  { %v2608_v3 = vpop.f32.mrb[33].mxu0 }
 0x2a0   :  { %v2609_v58 = vadd.f32 %v2608_v3, %v2607_v57  ;;  %v2610_v39 = vpop.f32.mrb[34].mxu0  ;;  %v2534_v3 = vcombine.low %v2119_v61, %v2131_v1  ;;  %v2155_v57 = vrot.slane %v3618_v42, %v3099_v21  ;;  %v1963_v42 = vrot.slane %v3634_v27, %v3099_v21  ;;  %v2231_v1 = vpop.permute.xlu0 %2230 }
 0x2a1   :  { %v2611_v2 = vpop.f32.mrb[35].mxu0  ;;  %v2388_v22 = vmax.bf16 %v3867_v17, %v2372_v10  ;;  %v3869_v27 = vpack.c.bf16 %v3610_v38, %v3606_v62  ;;  %v2536_v61 = vcombine.low %v2167_v20, %v2179_v30  ;;  %v2389_v62 = vmax.bf16 %v3867_v17, %v2373_v25  ;;  %v3883_v11 = vld [vmem:[#allocation8_spill] sm:$0xff] }
 0x2a2   :  { %v2612_v8 = vadd.f32 %v2611_v2, %v2610_v39  ;;  %v2143_v2 = vrot.slane %v3616_v40, %v3099_v21  ;;  %v2381_v49 = vadd.bf16 %v2534_v3, %v3866_v4  ;;  %v1951_v40 = vrot.slane %v3632_v59, %v3099_v21  ;;  %v2051_v34 = vpop.permute.xlu1 %2050 }
 0x2a3   :  { %v1987_v59 = vrot.slane %v3666_v60, %v3099_v21  ;;  %v3870_v38 = vpack.c.bf16 %v3624_v41, %v3620_v45  ;;  %v3871_v3 = vpack.c.bf16 %v3626_v55, %v3622_v46  ;;  %v2227_v45 = vrot.slane %v3702_v19, %v3099_v21 }
 0x2a4   :  { %v1852_v9 = vpack.c.bf16 %v2612_v8, %v2609_v58  ;;  %v2535_v58 = vcombine.low %v2143_v2, %v2155_v57  ;;  %v2397_v31 = vmax.bf16 %v3867_v17, %v2381_v49  ;;  %v2527_v39 = vcombine.low %v1951_v40, %v1963_v42  ;;  %v2039_v60 = vpop.permute.xlu0 %2038 }
 0x2a5   :  { %v2383_v57 = vadd.bf16 %v2536_v61, %v3871_v3  ;;  %v1999_v41 = vrot.slane %v3698_v0, %v3099_v21  ;;  %v3872_v46 = vpack.c.bf16 %v3640_v14, %v3636_v5  ;;  %v2215_v10 = vrot.slane %v3706_v32, %v3099_v21 }
 0x2a6   :  { %v2380_v33 = vadd.bf16 %v2533_v13, %v1852_v9  ;;  %v2382_v13 = vadd.bf16 %v2535_v58, %v3869_v27  ;;  %v2374_v8 = vadd.bf16 %v2527_v39, %v3870_v38  ;;  %v2528_v9 = vcombine.low %v1975_v15, %v1987_v59  ;;  %v2267_v2 = vpop.permute.xlu1 %2266 }
 0x2a7   :  { %v2384_v4 = vadd.bf16 %v2537_v23, %v3873_v50  ;;  %v2399_v19 = vmax.bf16 %v3867_v17, %v2383_v57  ;;  %v2529_v49 = vcombine.low %v1999_v41, %v2011_v53  ;;  %v2035_v0 = vrot.slane %v3716_v28, %v3099_v21 }
 0x2a8   :  { %v2396_v24 = vmax.bf16 %v3867_v17, %v2380_v33  ;;  %v2398_v63 = vmax.bf16 %v3867_v17, %v2382_v13  ;;  %v2390_v43 = vmax.bf16 %v3867_v17, %v2374_v8  ;;  %v2375_v55 = vadd.bf16 %v2528_v9, %v3872_v46  ;;  %v2255_v33 = vpop.permute.xlu0 %2254  ;;  %v3882_v8 = vld [vmem:[#allocation9_spill] sm:$0xff] }
 0x2a9   :  { %v2538_v52 = vcombine.low %v2215_v10, %v2227_v45  ;;  %v2251_v5 = vrot.slane %v2243_v26, %v3099_v21  ;;  %v2023_v14 = vrot.slane %v3724_v7, %v3099_v21  ;;  %v2376_v16 = vadd.bf16 %v2529_v49, %v3874_v6 }
 0x2aa   :  { %2655 = vmatprep.subr.bf16.mxu1 %v2396_v24  ;;  %v2391_v32 = vmax.bf16 %v3867_v17, %v2375_v55  ;;  %v2239_v42 = vrot.slane %v2231_v1, %v3099_v21  ;;  %v3875_v28 = vpack.c.bf16 %v3658_v47, %v3654_v29  ;;  %v2400_v30 = vmax.bf16 %v3867_v17, %v2384_v4 }
 0x2ab   :  { %2656 = vmatpush3.bf16.msra.mxu1 %v2388_v22  ;;  %v2530_v24 = vcombine.low %v2023_v14, %v2035_v0  ;;  %v2059_v26 = vrot.slane %v2051_v34, %v3099_v21  ;;  %v2275_v7 = vrot.slane %v2267_v2, %v3099_v21  ;;  %v2075_v22 = vpop.permute.xlu1 %2074  ;;  %v2047_v36 = vrot.slane %v2039_v60, %v3099_v21  ;;  %v3880_v34 = vld [vmem:[#allocation6_spill] sm:$0xff] }
 0x2ac   :  { %2657 = vmatprep.subr.bf16.mxu1 %v2397_v31  ;;  %v2385_v58 = vadd.bf16 %v2538_v52, %v3875_v28  ;;  %v2539_v40 = vcombine.low %v2239_v42, %v2251_v5  ;;  %v2392_v44 = vmax.bf16 %v3867_v17, %v2376_v16  ;;  %v3876_v1 = vpack.c.bf16 %v3672_v35, %v3668_v12  ;;  %v2063_v18 = vpop.permute.xlu0 %2062 }
 0x2ad   :  { %v2263_v47 = vrot.slane %v2255_v33, %v3099_v21  ;;  %v3877_v25 = vpack.c.bf16 %v3674_v37, %v3670_v48  ;;  %v2531_v13 = vcombine.low %v2047_v36, %v2059_v26  ;;  %v2083_v31 = vrot.slane %v2075_v22, %v3099_v21 }
 0x2ae   :  { %v2377_v29 = vadd.bf16 %v2530_v24, %v3876_v1  ;;  %v2401_v27 = vmax.bf16 %v3867_v17, %v2385_v58  ;;  %v2071_v59 = vrot.slane %v2063_v18, %v3099_v21  ;;  %v3878_v35 = vpack.c.bf16 %v3688_v56, %v3684_v51  ;;  %v3885_v56 = vld [vmem:[#allocation5_spill] sm:$0xff] }
 0x2af   :  { %2658 = vmatpush3.bf16.msra.mxu1 %v2389_v62  ;;  %v2386_v20 = vadd.bf16 %v2539_v40, %v3877_v25  ;;  %v2540_v39 = vcombine.low %v2263_v47, %v2275_v7  ;;  %v3881_v48 = vpack.c.bf16 %v3879_v54, %v3880_v34  ;;  %v3884_v21 = vpack.c.bf16 %v3882_v8, %v3883_v11 }
 0x2b0   :  { %2659 = vmatprep.subr.bf16.mxu1 %v2398_v63  ;;  %v2393_v12 = vmax.bf16 %v3867_v17, %v2377_v29  ;;  %v2378_v61 = vadd.bf16 %v2531_v13, %v3878_v35  ;;  %v2532_v62 = vcombine.low %v2071_v59, %v2083_v31  ;;  %v2541_v57 = vcombine.low %v3885_v56, %v3885_v56  ;;  %v2409_v45 = vpop.permute.xlu0 %2408 }
 0x2b1   :  { %v2387_v37 = vadd.bf16 %v2540_v39, %v3881_v48  ;;  %v2402_v15 = vmax.bf16 %v3867_v17, %v2386_v20 }
 0x2b2   :  { %v2394_v38 = vmax.bf16 %v3867_v17, %v2378_v61  ;;  %v2379_v60 = vadd.bf16 %v2532_v62, %v3884_v21 }
 0x2b3   :  { %2660 = vmatpush3.bf16.msra.mxu1 %v2390_v43  ;;  %v2403_v3 = vmax.bf16 %v3867_v17, %v2387_v37 }
 0x2b4   :  { %2661 = vmatprep.subr.bf16.mxu1 %v2399_v19  ;;  %v2395_v51 = vmax.bf16 %v3867_v17, %v2379_v60 }
 0x2b7   :  { %2662 = vmatpush3.bf16.msra.mxu1 %v2391_v32 }
 0x2b8   :  { %2663 = vmatprep.subr.bf16.mxu1 %v2400_v30 }
 0x2bb   :  { %2664 = vmatpush3.bf16.msra.mxu1 %v2392_v44 }
 0x2bc   :  { %2665 = vmatprep.subr.bf16.mxu1 %v2401_v27 }
 0x2bf   :  { %2666 = vmatpush3.bf16.msra.mxu1 %v2393_v12 }
 0x2c0   :  { %2667 = vmatprep.subr.bf16.mxu1 %v2402_v15 }
 0x2c3   :  { %2668 = vmatpush3.bf16.msra.mxu1 %v2394_v38 }
 0x2c4   :  { %2669 = vmatprep.subr.bf16.mxu1 %v2403_v3 }
 0x2c7   :  { %2670 = vmatpush3.bf16.msra.mxu1 %v2395_v51 }
 0x2ca   :  { %2451 = vmatmul.mubr.bf16.vlgmr.msra.gmra.mrb[28].mxu1 %v2541_v57 }
 0x39d   :  { %v2671_v63 = vpop.f32.mrb[28].mxu1 }
 0x39e   :  { %v2672_v9 = vpop.f32.mrb[29].mxu1 }
 0x39f   :  { %v2673_v53 = vadd.f32 %v2672_v9, %v2671_v63  ;;  %v2674_v23 = vpop.f32.mrb[30].mxu1 }
 0x3a0   :  { %v2675_v41 = vpop.f32.mrb[31].mxu1 }
 0x3a1   :  { %v2453_v43 = vadd.f32 %v2673_v53, %v2409_v45 }
 0x3a3   :  { %2782 = vtanh.f32 %v2453_v43 }
 0x3ad   :  { %v2783_v46 = vpop.eup %2782 }
 0x3ae   :  { %2460 = vst.msk [vmem:[#allocation2] sm:$0xff] %vm2459_vm0, %v2783_v46 }
 0x3af   :  { %2795 = shalt.err (!%p2792_p4)
}
 0x3b0   :  { %s2796_s15 = scalar_lea.hbm %s3852_s7, 128 }
 0x3b1   :  { %p2797_p5 = scmp.ne.s32.totalorder %s3852_s7, %s2796_s15  ;;  %p2800_p6 = scmp.lt.u32.totalorder %s2796_s15, %s3852_s7 }
 0x3b3   :  { %p2802_p7 = pnand %p2800_p6, %p2797_p5 }
 0x3b5   :  { %2805 = shalt.err (!%p2802_p7)
}
 0x3b6   :  { %2470 = dma.vmem_to_hbm [thread:$0]  %s2468_s5, 128, %s3852_s7, [#allocation3]  }
 0x3b7   :  { %2806 = dma.done.wait [#allocation3], 128  }
 0x3b8   :  { %2807 = vsyncadd [#allocation3], 4294967168 }
 0x3b9   :  { %2474 = vsyncpa [#allocation3], 1 }

</bundles_post_ra>
